<compile_context>
chip_gen: v6e
topology: v6e:2x2x1
jax: 0.10.0
libtpu: 0.0.40
codegen_flags: <defaults>
</compile_context>

<pallas_src>
import numpy as np
import jax
import jax.numpy as jnp
from jax import lax
from jax.experimental import pallas as pl
from jax.experimental.pallas import tpu as pltpu

N_PR = 3
F = 1001          # hardcoded by the PyTorch module (res = ones((B, 1001, 2)))
F_PAD = 1024      # lane-dense (multiple of 128)
CHUNK = 8         # rows per inner compute chunk (one sublane group)


def tf2s_kernel(p_ref, w_ref, re_ref, im_ref):
    # p_ref  : (TB, 4*N_PR) VMEM -> (tfc + 100) for TB batch rows
    # w_ref  : (1, F_PAD)   VMEM -> 2*pi*(freq + 450), lane-padded (resident)
    # re_ref : (TB, F_PAD)  VMEM -> real part (lane-dense)
    # im_ref : (TB, F_PAD)  VMEM -> imag part (lane-dense)
    w_row = w_ref[...]                              # (1, F_PAD)
    n_chunks = p_ref.shape[0] // CHUNK              # static

    def chunk_body(c, carry):
        r0 = pl.multiple_of(c * CHUNK, CHUNK)
        p = p_ref[pl.ds(r0, CHUNK), :]                    # (CHUNK, 12)
        wb = jnp.broadcast_to(w_row, (CHUNK, F_PAD))      # 1 broadcast / chunk
        acc_r = jnp.zeros((CHUNK, F_PAD), jnp.float32)
        acc_i = jnp.zeros((CHUNK, F_PAD), jnp.float32)

        # Unrolled loop over the 3 poles: pure VPU work, no cross-sublane reduce.
        for k in range(N_PR):
            ar = p[:, k:k + 1]                            # (CHUNK, 1)
            ai = p[:, N_PR + k:N_PR + k + 1]
            cr = p[:, 2 * N_PR + k:2 * N_PR + k + 1]
            ci = p[:, 3 * N_PR + k:3 * N_PR + k + 1]

            ar2 = ar * ar
            pos = ai > 0.0                                # (CHUNK, 1)
            m = pos.astype(jnp.float32)
            cr_m = cr * m
            ci_m = ci * m
            two_ai = ai + ai

            d1 = wb - ai                                  # (CHUNK, F_PAD)
            d2 = d1 + two_ai                              # == wb + ai (no re-broadcast)
            den1 = ar2 + d1 * d1
            # rows with ai <= 0 never use pass 2: force a benign denominator
            den2 = jnp.where(pos, ar2 + d2 * d2, 1.0)

            # merged reciprocal: one exact divide serves both passes
            inv12 = 1.0 / (den1 * den2)
            inv1 = inv12 * den2
            inv2 = inv12 * den1

            # ---- pass 1: every pole ----
            acc_r = acc_r + (ci * d1 - cr * ar) * inv1
            acc_i = acc_i - (cr * d1 + ci * ar) * inv1
            # ---- pass 2: conjugate pole, only where ai > 0 (mask in scalars) ----
            acc_r = acc_r - (cr_m * ar + ci_m * d2) * inv2
            acc_i = acc_i + (ci_m * ar - cr_m * d2) * inv2

        re_ref[pl.ds(r0, CHUNK), :] = acc_r
        im_ref[pl.ds(r0, CHUNK), :] = acc_i
        return carry

    lax.fori_loop(0, n_chunks, chunk_body, 0, unroll=True)


def _round_up(x, m):
    return ((x + m - 1) // m) * m


def tf2s_planes(tfc, freq, n_pr=N_PR):
    """Fast path: returns (real, imag) planes, each (B, 1001) float32."""
    assert n_pr == N_PR
    B = tfc.shape[0]
    assert freq.shape[0] == F, "module hardcodes 1001 frequency points"

    # Row-block selection:
    #   * B <= 8 -> single 8-row step.
    #   * otherwise: at least 2 grid steps (both v7x TensorCores get work),
    #     up to 128 rows per step to amortize the ~0.35 us per-step overhead.
    B_pad = _round_up(B, CHUNK)
    if B_pad <= CHUNK:
        TB = CHUNK
    else:
        TB = min(128, _round_up(B_pad // 2, CHUNK))
        B_pad = _round_up(B_pad, TB)

    # Pad rows with zeros BEFORE the +100 offset so padded rows have strictly
    # positive denominators (no Inf/NaN in dead rows).
    params = jnp.pad(tfc.astype(jnp.float32), ((0, B_pad - B), (0, 0))) + 100.0

    # Hoist 2*pi*(freq+450) out of the kernel; pad dead lanes with the edge
    # frequency so padded-lane denominators stay benign.
    w = 2.0 * np.pi * (freq.astype(jnp.float32) + 450.0)
    w = jnp.pad(w, (0, F_PAD - F), mode="edge").reshape(1, F_PAD)

    grid = (B_pad // TB,)
    n_elem = B_pad * F_PAD
    cost = pl.CostEstimate(
        flops=75 * n_elem,                 # ~25 VPU ops/pole/element * 3 poles
        transcendentals=3 * n_elem,        # one reciprocal per pole per element
        bytes_accessed=8 * n_elem + params.size * 4 + F_PAD * 4,
    )

    re, im = pl.pallas_call(
        tf2s_kernel,
        out_shape=(
            jax.ShapeDtypeStruct((B_pad, F_PAD), jnp.float32),
            jax.ShapeDtypeStruct((B_pad, F_PAD), jnp.float32),
        ),
        grid=grid,
        in_specs=[
            pl.BlockSpec((TB, 4 * n_pr), lambda n: (n, 0)),
            pl.BlockSpec((1, F_PAD), lambda n: (0, 0)),
        ],
        out_specs=(
            pl.BlockSpec((TB, F_PAD), lambda n: (n, 0)),
            pl.BlockSpec((TB, F_PAD), lambda n: (n, 0)),
        ),
        compiler_params=pltpu.CompilerParams(
            dimension_semantics=("parallel",)),
        cost_estimate=cost,
    )(params, w)

    return re[:B, :F], im[:B, :F]


def tf2s_forward(tfc, freq, n_pr=N_PR):
    """JAX/Pallas equivalent of tf2s.forward. Returns (B, 1001, 2) float32.

    The final stack is pure layout glue for PyTorch compatibility; consumers
    that can take separate real/imag planes should call tf2s_planes directly
    and skip the (B, F, 2) relayout (it re-reads/re-writes the whole result).
    """
    re, im = tf2s_planes(tfc, freq, n_pr)
    return jnp.stack([re, im], axis=-1)


def tf2s_reference(tfc, freq, n_pr=N_PR):
    """Plain-JAX mirror of the PyTorch loop (mask instead of boolean gather)."""
    tfc = tfc.astype(jnp.float32) + 100.0
    freq = freq.astype(jnp.float32) + 450.0
    fr = jnp.tile(freq[None, :], (n_pr, 1)).T        # (F, n_pr)
    rows = []
    for n in range(tfc.shape[0]):
        ars = tfc[n, 0:n_pr]
        ais = tfc[n, n_pr:2 * n_pr]
        crs = tfc[n, 2 * n_pr:3 * n_pr]
        cis = tfc[n, 3 * n_pr:4 * n_pr]

        d = 2 * np.pi * fr - ais
        c2_d2 = ars ** 2 + d ** 2
        r = (-crs * ars + cis * d) / c2_d2
        i = (-cis * ars - crs * d) / c2_d2
        tr = jnp.sum(r, 1)
        ti = jnp.sum(i, 1)

        m = (ais > 0).astype(jnp.float32)
        d = 2 * np.pi * fr + ais
        c2_d2 = ars ** 2 + d ** 2
        r = (-crs * ars - cis * d) / c2_d2
        i = (cis * ars - crs * d) / c2_d2
        tr = tr + jnp.sum(r * m, 1)
        ti = ti + jnp.sum(i * m, 1)
        rows.append(jnp.stack([tr, ti], axis=-1))
    return jnp.stack(rows, 0)


if __name__ == "__main__":
    key = jax.random.PRNGKey(0)
    k_tfc, k_freq = jax.random.split(key)

    B = 2
    # scale so that (tfc + 100) has mixed signs -> exercises the ais > 0 mask
    tfc = jax.random.normal(k_tfc, (B, 4 * N_PR), dtype=jnp.float32) * 120.0
    freq = jnp.linspace(0.0, 500.0, F, dtype=jnp.float32) \
        + jax.random.uniform(k_freq, (F,), dtype=jnp.float32)

    out = tf2s_forward(tfc, freq)
    out = jax.block_until_ready(out)

    ref = tf2s_reference(tfc, freq)
    assert out.shape == (B, F, 2), out.shape
    np.testing.assert_allclose(np.asarray(out), np.asarray(ref),
                               rtol=1e-5, atol=1e-5)
    print("KERNEL_OK")
</pallas_src>

<mosaic_0001>
module attributes {stable_mosaic.version = 11 : i64} {
  func.func @tf2s_kernel(%arg0: i32, %arg1: memref<8x12xf32, #tpu.memory_space<vmem>>, %arg2: memref<1x1024xf32, #tpu.memory_space<vmem>>, %arg3: memref<8x1024xf32, #tpu.memory_space<vmem>>, %arg4: memref<8x1024xf32, #tpu.memory_space<vmem>>) attributes {dimension_semantics = [#tpu.dimension_semantics<parallel>], iteration_bounds = array<i64: 1>, scalar_prefetch = 0 : i64, scratch_operands = 0 : i64, tpu.core_type = #tpu.core_type<tc>, window_params = [{transform_indices = @transform_0, window_bounds = array<i64: 8, 12>}, {pipeline_mode = #tpu.pipeline_mode<synchronous>, transform_indices = @transform_1, window_bounds = array<i64: 1, 1024>}, {transform_indices = @transform_2, window_bounds = array<i64: 8, 1024>}, {transform_indices = @transform_3, window_bounds = array<i64: 8, 1024>}]} {
    %c0 = arith.constant 0 : index
    %c0_0 = arith.constant 0 : index
    %0 = vector.load %arg2[%c0, %c0_0] : memref<1x1024xf32, #tpu.memory_space<vmem>>, vector<1x1024xf32>
    %c0_i32 = arith.constant 0 : i32
    %c8_i32 = arith.constant 8 : i32
    %1 = arith.muli %c0_i32, %c8_i32 : i32
    %2 = tpu.assume_multiple %1, 8 : i32
    %3 = arith.index_cast %2 : i32 to index
    %c0_1 = arith.constant 0 : index
    %4 = vector.load %arg1[%3, %c0_1] : memref<8x12xf32, #tpu.memory_space<vmem>>, vector<8x12xf32>
    %5 = vector.shape_cast %0 : vector<1x1024xf32> to vector<1x1024xf32>
    %6 = vector.broadcast %5 : vector<1x1024xf32> to vector<8x1024xf32>
    %cst = arith.constant 0.000000e+00 : f32
    %7 = vector.broadcast %cst : f32 to vector<8x1024xf32>
    %cst_2 = arith.constant 0.000000e+00 : f32
    %8 = vector.broadcast %cst_2 : f32 to vector<8x1024xf32>
    %9 = vector.extract_strided_slice %4 {offsets = [0, 0], sizes = [8, 1], strides = [1, 1]} : vector<8x12xf32> to vector<8x1xf32>
    %10 = vector.extract_strided_slice %4 {offsets = [0, 3], sizes = [8, 1], strides = [1, 1]} : vector<8x12xf32> to vector<8x1xf32>
    %11 = vector.extract_strided_slice %4 {offsets = [0, 6], sizes = [8, 1], strides = [1, 1]} : vector<8x12xf32> to vector<8x1xf32>
    %12 = vector.extract_strided_slice %4 {offsets = [0, 9], sizes = [8, 1], strides = [1, 1]} : vector<8x12xf32> to vector<8x1xf32>
    %13 = arith.mulf %9, %9 : vector<8x1xf32>
    %cst_3 = arith.constant 0.000000e+00 : f32
    %14 = vector.broadcast %cst_3 : f32 to vector<8x1xf32>
    %15 = arith.cmpf ogt, %10, %14 : vector<8x1xf32>
    %16 = arith.extui %15 : vector<8x1xi1> to vector<8x1xi32>
    %17 = arith.sitofp %16 : vector<8x1xi32> to vector<8x1xf32>
    %18 = arith.mulf %11, %17 : vector<8x1xf32>
    %19 = arith.mulf %12, %17 : vector<8x1xf32>
    %20 = arith.addf %10, %10 : vector<8x1xf32>
    %21 = vector.broadcast %10 : vector<8x1xf32> to vector<8x1024xf32>
    %22 = arith.subf %6, %21 : vector<8x1024xf32>
    %23 = vector.broadcast %20 : vector<8x1xf32> to vector<8x1024xf32>
    %24 = arith.addf %22, %23 : vector<8x1024xf32>
    %25 = arith.mulf %22, %22 : vector<8x1024xf32>
    %26 = vector.broadcast %13 : vector<8x1xf32> to vector<8x1024xf32>
    %27 = arith.addf %26, %25 : vector<8x1024xf32>
    %28 = arith.mulf %24, %24 : vector<8x1024xf32>
    %29 = vector.broadcast %13 : vector<8x1xf32> to vector<8x1024xf32>
    %30 = arith.addf %29, %28 : vector<8x1024xf32>
    %cst_4 = arith.constant 1.000000e+00 : f32
    %31 = vector.shape_cast %15 : vector<8x1xi1> to vector<8x1xi1>
    %32 = vector.broadcast %31 : vector<8x1xi1> to vector<8x1024xi1>
    %33 = vector.broadcast %cst_4 : f32 to vector<8x1024xf32>
    %34 = arith.select %32, %30, %33 : vector<8x1024xi1>, vector<8x1024xf32>
    %35 = arith.mulf %27, %34 : vector<8x1024xf32>
    %cst_5 = arith.constant 1.000000e+00 : f32
    %36 = vector.broadcast %cst_5 : f32 to vector<8x1024xf32>
    %37 = arith.divf %36, %35 : vector<8x1024xf32>
    %38 = arith.mulf %37, %34 : vector<8x1024xf32>
    %39 = arith.mulf %37, %27 : vector<8x1024xf32>
    %40 = vector.broadcast %12 : vector<8x1xf32> to vector<8x1024xf32>
    %41 = arith.mulf %40, %22 : vector<8x1024xf32>
    %42 = arith.mulf %11, %9 : vector<8x1xf32>
    %43 = vector.broadcast %42 : vector<8x1xf32> to vector<8x1024xf32>
    %44 = arith.subf %41, %43 : vector<8x1024xf32>
    %45 = arith.mulf %44, %38 : vector<8x1024xf32>
    %46 = arith.addf %7, %45 : vector<8x1024xf32>
    %47 = vector.broadcast %11 : vector<8x1xf32> to vector<8x1024xf32>
    %48 = arith.mulf %47, %22 : vector<8x1024xf32>
    %49 = arith.mulf %12, %9 : vector<8x1xf32>
    %50 = vector.broadcast %49 : vector<8x1xf32> to vector<8x1024xf32>
    %51 = arith.addf %48, %50 : vector<8x1024xf32>
    %52 = arith.mulf %51, %38 : vector<8x1024xf32>
    %53 = arith.subf %8, %52 : vector<8x1024xf32>
    %54 = arith.mulf %18, %9 : vector<8x1xf32>
    %55 = vector.broadcast %19 : vector<8x1xf32> to vector<8x1024xf32>
    %56 = arith.mulf %55, %24 : vector<8x1024xf32>
    %57 = vector.broadcast %54 : vector<8x1xf32> to vector<8x1024xf32>
    %58 = arith.addf %57, %56 : vector<8x1024xf32>
    %59 = arith.mulf %58, %39 : vector<8x1024xf32>
    %60 = arith.subf %46, %59 : vector<8x1024xf32>
    %61 = arith.mulf %19, %9 : vector<8x1xf32>
    %62 = vector.broadcast %18 : vector<8x1xf32> to vector<8x1024xf32>
    %63 = arith.mulf %62, %24 : vector<8x1024xf32>
    %64 = vector.broadcast %61 : vector<8x1xf32> to vector<8x1024xf32>
    %65 = arith.subf %64, %63 : vector<8x1024xf32>
    %66 = arith.mulf %65, %39 : vector<8x1024xf32>
    %67 = arith.addf %53, %66 : vector<8x1024xf32>
    %68 = vector.extract_strided_slice %4 {offsets = [0, 1], sizes = [8, 1], strides = [1, 1]} : vector<8x12xf32> to vector<8x1xf32>
    %69 = vector.extract_strided_slice %4 {offsets = [0, 4], sizes = [8, 1], strides = [1, 1]} : vector<8x12xf32> to vector<8x1xf32>
    %70 = vector.extract_strided_slice %4 {offsets = [0, 7], sizes = [8, 1], strides = [1, 1]} : vector<8x12xf32> to vector<8x1xf32>
    %71 = vector.extract_strided_slice %4 {offsets = [0, 10], sizes = [8, 1], strides = [1, 1]} : vector<8x12xf32> to vector<8x1xf32>
    %72 = arith.mulf %68, %68 : vector<8x1xf32>
    %cst_6 = arith.constant 0.000000e+00 : f32
    %73 = vector.broadcast %cst_6 : f32 to vector<8x1xf32>
    %74 = arith.cmpf ogt, %69, %73 : vector<8x1xf32>
    %75 = arith.extui %74 : vector<8x1xi1> to vector<8x1xi32>
    %76 = arith.sitofp %75 : vector<8x1xi32> to vector<8x1xf32>
    %77 = arith.mulf %70, %76 : vector<8x1xf32>
    %78 = arith.mulf %71, %76 : vector<8x1xf32>
    %79 = arith.addf %69, %69 : vector<8x1xf32>
    %80 = vector.broadcast %69 : vector<8x1xf32> to vector<8x1024xf32>
    %81 = arith.subf %6, %80 : vector<8x1024xf32>
    %82 = vector.broadcast %79 : vector<8x1xf32> to vector<8x1024xf32>
    %83 = arith.addf %81, %82 : vector<8x1024xf32>
    %84 = arith.mulf %81, %81 : vector<8x1024xf32>
    %85 = vector.broadcast %72 : vector<8x1xf32> to vector<8x1024xf32>
    %86 = arith.addf %85, %84 : vector<8x1024xf32>
    %87 = arith.mulf %83, %83 : vector<8x1024xf32>
    %88 = vector.broadcast %72 : vector<8x1xf32> to vector<8x1024xf32>
    %89 = arith.addf %88, %87 : vector<8x1024xf32>
    %cst_7 = arith.constant 1.000000e+00 : f32
    %90 = vector.shape_cast %74 : vector<8x1xi1> to vector<8x1xi1>
    %91 = vector.broadcast %90 : vector<8x1xi1> to vector<8x1024xi1>
    %92 = vector.broadcast %cst_7 : f32 to vector<8x1024xf32>
    %93 = arith.select %91, %89, %92 : vector<8x1024xi1>, vector<8x1024xf32>
    %94 = arith.mulf %86, %93 : vector<8x1024xf32>
    %cst_8 = arith.constant 1.000000e+00 : f32
    %95 = vector.broadcast %cst_8 : f32 to vector<8x1024xf32>
    %96 = arith.divf %95, %94 : vector<8x1024xf32>
    %97 = arith.mulf %96, %93 : vector<8x1024xf32>
    %98 = arith.mulf %96, %86 : vector<8x1024xf32>
    %99 = vector.broadcast %71 : vector<8x1xf32> to vector<8x1024xf32>
    %100 = arith.mulf %99, %81 : vector<8x1024xf32>
    %101 = arith.mulf %70, %68 : vector<8x1xf32>
    %102 = vector.broadcast %101 : vector<8x1xf32> to vector<8x1024xf32>
    %103 = arith.subf %100, %102 : vector<8x1024xf32>
    %104 = arith.mulf %103, %97 : vector<8x1024xf32>
    %105 = arith.addf %60, %104 : vector<8x1024xf32>
    %106 = vector.broadcast %70 : vector<8x1xf32> to vector<8x1024xf32>
    %107 = arith.mulf %106, %81 : vector<8x1024xf32>
    %108 = arith.mulf %71, %68 : vector<8x1xf32>
    %109 = vector.broadcast %108 : vector<8x1xf32> to vector<8x1024xf32>
    %110 = arith.addf %107, %109 : vector<8x1024xf32>
    %111 = arith.mulf %110, %97 : vector<8x1024xf32>
    %112 = arith.subf %67, %111 : vector<8x1024xf32>
    %113 = arith.mulf %77, %68 : vector<8x1xf32>
    %114 = vector.broadcast %78 : vector<8x1xf32> to vector<8x1024xf32>
    %115 = arith.mulf %114, %83 : vector<8x1024xf32>
    %116 = vector.broadcast %113 : vector<8x1xf32> to vector<8x1024xf32>
    %117 = arith.addf %116, %115 : vector<8x1024xf32>
    %118 = arith.mulf %117, %98 : vector<8x1024xf32>
    %119 = arith.subf %105, %118 : vector<8x1024xf32>
    %120 = arith.mulf %78, %68 : vector<8x1xf32>
    %121 = vector.broadcast %77 : vector<8x1xf32> to vector<8x1024xf32>
    %122 = arith.mulf %121, %83 : vector<8x1024xf32>
    %123 = vector.broadcast %120 : vector<8x1xf32> to vector<8x1024xf32>
    %124 = arith.subf %123, %122 : vector<8x1024xf32>
    %125 = arith.mulf %124, %98 : vector<8x1024xf32>
    %126 = arith.addf %112, %125 : vector<8x1024xf32>
    %127 = vector.extract_strided_slice %4 {offsets = [0, 2], sizes = [8, 1], strides = [1, 1]} : vector<8x12xf32> to vector<8x1xf32>
    %128 = vector.extract_strided_slice %4 {offsets = [0, 5], sizes = [8, 1], strides = [1, 1]} : vector<8x12xf32> to vector<8x1xf32>
    %129 = vector.extract_strided_slice %4 {offsets = [0, 8], sizes = [8, 1], strides = [1, 1]} : vector<8x12xf32> to vector<8x1xf32>
    %130 = vector.extract_strided_slice %4 {offsets = [0, 11], sizes = [8, 1], strides = [1, 1]} : vector<8x12xf32> to vector<8x1xf32>
    %131 = arith.mulf %127, %127 : vector<8x1xf32>
    %cst_9 = arith.constant 0.000000e+00 : f32
    %132 = vector.broadcast %cst_9 : f32 to vector<8x1xf32>
    %133 = arith.cmpf ogt, %128, %132 : vector<8x1xf32>
    %134 = arith.extui %133 : vector<8x1xi1> to vector<8x1xi32>
    %135 = arith.sitofp %134 : vector<8x1xi32> to vector<8x1xf32>
    %136 = arith.mulf %129, %135 : vector<8x1xf32>
    %137 = arith.mulf %130, %135 : vector<8x1xf32>
    %138 = arith.addf %128, %128 : vector<8x1xf32>
    %139 = vector.broadcast %128 : vector<8x1xf32> to vector<8x1024xf32>
    %140 = arith.subf %6, %139 : vector<8x1024xf32>
    %141 = vector.broadcast %138 : vector<8x1xf32> to vector<8x1024xf32>
    %142 = arith.addf %140, %141 : vector<8x1024xf32>
    %143 = arith.mulf %140, %140 : vector<8x1024xf32>
    %144 = vector.broadcast %131 : vector<8x1xf32> to vector<8x1024xf32>
    %145 = arith.addf %144, %143 : vector<8x1024xf32>
    %146 = arith.mulf %142, %142 : vector<8x1024xf32>
    %147 = vector.broadcast %131 : vector<8x1xf32> to vector<8x1024xf32>
    %148 = arith.addf %147, %146 : vector<8x1024xf32>
    %cst_10 = arith.constant 1.000000e+00 : f32
    %149 = vector.shape_cast %133 : vector<8x1xi1> to vector<8x1xi1>
    %150 = vector.broadcast %149 : vector<8x1xi1> to vector<8x1024xi1>
    %151 = vector.broadcast %cst_10 : f32 to vector<8x1024xf32>
    %152 = arith.select %150, %148, %151 : vector<8x1024xi1>, vector<8x1024xf32>
    %153 = arith.mulf %145, %152 : vector<8x1024xf32>
    %cst_11 = arith.constant 1.000000e+00 : f32
    %154 = vector.broadcast %cst_11 : f32 to vector<8x1024xf32>
    %155 = arith.divf %154, %153 : vector<8x1024xf32>
    %156 = arith.mulf %155, %152 : vector<8x1024xf32>
    %157 = arith.mulf %155, %145 : vector<8x1024xf32>
    %158 = vector.broadcast %130 : vector<8x1xf32> to vector<8x1024xf32>
    %159 = arith.mulf %158, %140 : vector<8x1024xf32>
    %160 = arith.mulf %129, %127 : vector<8x1xf32>
    %161 = vector.broadcast %160 : vector<8x1xf32> to vector<8x1024xf32>
    %162 = arith.subf %159, %161 : vector<8x1024xf32>
    %163 = arith.mulf %162, %156 : vector<8x1024xf32>
    %164 = arith.addf %119, %163 : vector<8x1024xf32>
    %165 = vector.broadcast %129 : vector<8x1xf32> to vector<8x1024xf32>
    %166 = arith.mulf %165, %140 : vector<8x1024xf32>
    %167 = arith.mulf %130, %127 : vector<8x1xf32>
    %168 = vector.broadcast %167 : vector<8x1xf32> to vector<8x1024xf32>
    %169 = arith.addf %166, %168 : vector<8x1024xf32>
    %170 = arith.mulf %169, %156 : vector<8x1024xf32>
    %171 = arith.subf %126, %170 : vector<8x1024xf32>
    %172 = arith.mulf %136, %127 : vector<8x1xf32>
    %173 = vector.broadcast %137 : vector<8x1xf32> to vector<8x1024xf32>
    %174 = arith.mulf %173, %142 : vector<8x1024xf32>
    %175 = vector.broadcast %172 : vector<8x1xf32> to vector<8x1024xf32>
    %176 = arith.addf %175, %174 : vector<8x1024xf32>
    %177 = arith.mulf %176, %157 : vector<8x1024xf32>
    %178 = arith.subf %164, %177 : vector<8x1024xf32>
    %179 = arith.mulf %137, %127 : vector<8x1xf32>
    %180 = vector.broadcast %136 : vector<8x1xf32> to vector<8x1024xf32>
    %181 = arith.mulf %180, %142 : vector<8x1024xf32>
    %182 = vector.broadcast %179 : vector<8x1xf32> to vector<8x1024xf32>
    %183 = arith.subf %182, %181 : vector<8x1024xf32>
    %184 = arith.mulf %183, %157 : vector<8x1024xf32>
    %185 = arith.addf %171, %184 : vector<8x1024xf32>
    %186 = arith.index_cast %2 : i32 to index
    %c0_12 = arith.constant 0 : index
    %187 = vector.load %arg3[%186, %c0_12] : memref<8x1024xf32, #tpu.memory_space<vmem>>, vector<8x1024xf32>
    tpu.vector_store %arg3[%186, %c0_12], %178 {strides = array<i32>} : memref<8x1024xf32, #tpu.memory_space<vmem>>, vector<8x1024xf32>,
    %188 = arith.index_cast %2 : i32 to index
    %c0_13 = arith.constant 0 : index
    %189 = vector.load %arg4[%188, %c0_13] : memref<8x1024xf32, #tpu.memory_space<vmem>>, vector<8x1024xf32>
    tpu.vector_store %arg4[%188, %c0_13], %185 {strides = array<i32>} : memref<8x1024xf32, #tpu.memory_space<vmem>>, vector<8x1024xf32>,
    %c1_i32 = arith.constant 1 : i32
    return
  }
  func.func @transform_0(%arg0: i32) -> (i32, i32) {
    %c0_i32 = arith.constant 0 : i32
    %c0_i32_0 = arith.constant 0 : i32
    return %arg0, %c0_i32 : i32, i32
  }
  func.func @transform_1(%arg0: i32) -> (i32, i32) {
    %c0_i32 = arith.constant 0 : i32
    %c0_i32_0 = arith.constant 0 : i32
    %c0_i32_1 = arith.constant 0 : i32
    return %c0_i32, %c0_i32_0 : i32, i32
  }
  func.func @transform_2(%arg0: i32) -> (i32, i32) {
    %c0_i32 = arith.constant 0 : i32
    %c0_i32_0 = arith.constant 0 : i32
    return %arg0, %c0_i32 : i32, i32
  }
  func.func @transform_3(%arg0: i32) -> (i32, i32) {
    %c0_i32 = arith.constant 0 : i32
    %c0_i32_0 = arith.constant 0 : i32
    return %arg0, %c0_i32 : i32, i32
  }
}

</mosaic_0001>

<bundles_post_ra>
// kernel: tpu_custom_call.1
= control target key start
LH: loop header
LB: loop body
LE: loop exit
PB: predicated region body
PF: predicated region fallthrough
CT: control target
= control target key end

     0   :  { %9 = vsyncpa [#allocation3], 0  ;;  %s2609_s0 = inlined_call_operand.hbm [shape: f32[8,12], index: 0, kind: input, shape index: {}]   ;;  %s2610_s1 = inlined_call_operand.hbm [shape: f32[1,1024], index: 1, kind: input, shape index: {}]   ;;  %s2611_s2 = inlined_call_operand.hbm [shape: f32[8,1024], index: 2, kind: output, shape index: {0}]   ;;  %s2612_s3 = inlined_call_operand.hbm [shape: f32[8,1024], index: 3, kind: output, shape index: {1}]  }
   0x1   :  { %10 = vsyncpa [#allocation6], 0 }
   0x2   :  { %11 = vsyncpa [#allocation4], 0 }
   0x3   :  { %12 = vsyncpa [#allocation9], 0  ;;  %s1173_s12 = smov [#allocation2]   ;;  %s1174_s14 = smov [#allocation5]  }
   0x4   :  { %s19_s13 = sshll.u32 %s1173_s12, 4  ;;  %s29_s15 = sshll.u32 %s1174_s14, 4  ;;  %s20_s13 = int_to_ptr.vmem [resolvable:$true] %s19_s13  ;;  %s30_s15 = int_to_ptr.vmem [resolvable:$true] %s29_s15 }
   0x5   :  { %s1093_s16 = scalar_lea.vmem %s20_s13, 128  ;;  %p1098_p1 = scmp.lt.s32.totalorder %s20_s13, %s20_s13 }
   0x6   :  { %p1094_p0 = scmp.ne.s32.totalorder %s20_s13, %s1093_s16  ;;  %p1099_p2 = scmp.lt.s32.totalorder %s1093_s16, %s1093_s16 }
   0x8   :  { %p1100_p3 = por %p1099_p2, %p1098_p1 }
   0xa   :  { %p1101_p4 = pnand %p1100_p3, %p1094_p0 }
   0xc   :  { %1104 = shalt.err (!%p1101_p4)
}
   0xd   :  { %22 = dma.hbm_to_vmem [thread:$0]  %s2609_s0, 128, %s20_s13, [#allocation3]  }
   0xe   :  { %s1113_s19 = scalar_lea.vmem %s30_s15, 128  ;;  %p1118_p6 = scmp.lt.s32.totalorder %s30_s15, %s30_s15 }
   0xf   :  { %p1114_p5 = scmp.ne.s32.totalorder %s30_s15, %s1113_s19  ;;  %p1119_p7 = scmp.lt.s32.totalorder %s1113_s19, %s1113_s19 }
  0x11   :  { %p1120_p8 = por %p1119_p7, %p1118_p6 }
  0x13   :  { %p1121_p9 = pnand %p1120_p8, %p1114_p5 }
  0x15   :  { %1124 = shalt.err (!%p1121_p9)
}
  0x16   :  { %32 = dma.hbm_to_vmem [thread:$0]  %s2610_s1, 128, %s30_s15, [#allocation6]  }
  0x17   :  { %1165 = dma.done.wait [#allocation3], 128  }
  0x18   :  { %1166 = vsyncadd [#allocation3], 4294967168 }
  0x19   :  { %1167 = dma.done.wait [#allocation6], 128  }
  0x1a   :  { %1168 = vsyncadd [#allocation6], 4294967168  ;;  %v1175_v0 = vmov 3   ;;  %v1176_v1 = vmov 0   ;;  %v1219_v2 = vld [vmem:[#allocation2] sm:$0xff]  ;;  %s1177_s0 = smov 9   ;;  %v42_v20 = vlaneseq }
  0x1b   :  { %1003 = vset.pattern.permute.xlu1 %v1175_v0  ;;  %1004 = vset.pattern.permute.xlu0 %v1176_v1  ;;  %vm83_vm0 = vcmp.gt.f32.partialorder %v1219_v2, 0.0  ;;  %v1178_v3 = vmov 0.0   ;;  %s1179_s1 = smov 6   ;;  %s1180_s22 = smov 3   ;;  %v95_v5 = vadd.f32 %v1219_v2, %v1219_v2  ;;  %v82_v6 = vmul.f32 %v1219_v2, %v1219_v2  ;;  %v39_v30 = vld [vmem:[#allocation5] sm:$0xff] }
  0x1c   :  { %268 = vrot.lane.b32.xlu0 %v1219_v2, %s1177_s0  ;;  %98 = vperm.xlu1 %1003, %v1219_v2   ;;  %v982_v4 = vsel %vm83_vm0, 1.0, %v1178_v3  ;;  %v84_v7 = vsel %vm83_vm0, 1, %v1176_v1  ;;  %v1181_v8 = vmov 9   ;;  %v1182_v9 = vmov 4   ;;  %s1191_s23 = smov [#allocation7]   ;;  %s1192_s25 = smov [#allocation8]  }
  0x1d   :  { %v1183_v10 = vmov 6   ;;  %v1184_v11 = vmov 1   ;;  %v1185_v12 = vmov 2   ;;  %v1186_v13 = vmov 5   ;;  %s958_s24 = sshll.u32 %s1191_s23, 4  ;;  %s968_s26 = sshll.u32 %s1192_s25, 4  ;;  %s2580_s24 = int_to_ptr.vmem [resolvable:$true] %s958_s24  ;;  %s969_s26 = int_to_ptr.vmem [resolvable:$true] %s968_s26 }
  0x1e   :  { %v1187_v14 = vmov 10   ;;  %v1188_v15 = vmov 11   ;;  %v1189_v16 = vmov 7   ;;  %v1190_v17 = vmov 8   ;;  %s1125_s27 = scalar_lea.vmem %s2580_s24, 1024  ;;  %p1130_p11 = scmp.lt.s32.totalorder %s2580_s24, %s2580_s24 }
  0x1f   :  { %v43_v22 = vshrl.u32 %v42_v20, 7  ;;  %p1126_p10 = scmp.ne.s32.totalorder %s2580_s24, %s1125_s27  ;;  %p1131_p12 = scmp.lt.s32.totalorder %s1125_s27, %s1125_s27 }
  0x20   :  { %223 = vrot.lane.b32.xlu1 %v1219_v2, %s1179_s1  ;;  %87 = vrot.lane.b32.xlu0 %v982_v4, %s1180_s22 }
  0x21   :  { %v44_v25 = vsub.s32 0, %v43_v22  ;;  %v48_v26 = vsub.s32 1, %v43_v22  ;;  %v52_v27 = vsub.s32 2, %v43_v22  ;;  %v56_v28 = vsub.s32 3, %v43_v22  ;;  %p1132_p13 = por %p1131_p12, %p1130_p11 }
  0x22   :  { %v60_v29 = vsub.s32 4, %v43_v22  ;;  %v64_v32 = vsub.s32 5, %v43_v22  ;;  %v68_v33 = vsub.s32 6, %v43_v22  ;;  %v72_v34 = vsub.s32 7, %v43_v22 }
  0x23   :  { %v1256_v35 = vrot.slane %v39_v30, %v44_v25  ;;  %v1259_v37 = vrot.slane %v39_v30, %v48_v26  ;;  %v1261_v38 = vrot.slane %v39_v30, %v52_v27  ;;  %v1263_v39 = vrot.slane %v39_v30, %v56_v28  ;;  %p1133_p0 = pnand %p1132_p13, %p1126_p10 }
  0x24   :  { %111 = vperm.xlu1 %1003, %v95_v5   ;;  %91 = vrot.lane.b32.xlu0 %v982_v4, %s1179_s1  ;;  %v1265_v40 = vrot.slane %v39_v30, %v60_v29  ;;  %v1270_v42 = vrot.slane %v39_v30, %v64_v32  ;;  %v1272_v43 = vrot.slane %v39_v30, %v68_v33 }
  0x25   :  { %v1274_v44 = vrot.slane %v39_v30, %v72_v34 }
  0x28   :  { %160 = vperm.xlu1 %1003, %v84_v7   ;;  %132 = vperm.xlu0 %1004, %v82_v6  }
  0x2c   :  { %1005 = vset.pattern.permute.xlu1 %v1181_v8  ;;  %1007 = vset.pattern.permute.xlu0 %v1182_v9 }
  0x2d   :  { %212 = vperm.xlu1 %1005, %v1219_v2   ;;  %388 = vperm.xlu0 %1007, %v1219_v2  }
  0x31   :  { %1006 = vset.pattern.permute.xlu1 %v1183_v10  ;;  %1010 = vset.pattern.permute.xlu0 %v1184_v11 }
  0x32   :  { %257 = vperm.xlu1 %1006, %v1219_v2   ;;  %420 = vperm.xlu0 %1010, %v82_v6  }
  0x36   :  { %1008 = vset.pattern.permute.xlu1 %v1182_v9  ;;  %1012 = vset.pattern.permute.xlu0 %v1185_v12 }
  0x37   :  { %400 = vperm.xlu1 %1008, %v95_v5   ;;  %692 = vperm.xlu0 %1012, %v82_v6  }
  0x3b   :  { %1009 = vset.pattern.permute.xlu1 %v1186_v13  ;;  %1014 = vset.pattern.permute.xlu0 %v1187_v14 }
  0x3c   :  { %660 = vperm.xlu1 %1009, %v1219_v2   ;;  %500 = vperm.xlu0 %1014, %v1219_v2  }
  0x40   :  { %672 = vperm.xlu1 %1009, %v95_v5   ;;  %1016 = vset.pattern.permute.xlu0 %v1188_v15 }
  0x41   :  { %772 = vperm.xlu0 %1016, %v1219_v2  }
  0x44   :  { %1011 = vset.pattern.permute.xlu1 %v1182_v9 }
  0x45   :  { %448 = vperm.xlu1 %1011, %v84_v7   ;;  %1018 = vset.pattern.permute.xlu0 %v1183_v10 }
  0x49   :  { %1013 = vset.pattern.permute.xlu1 %v1186_v13 }
  0x4a   :  { %720 = vperm.xlu1 %1013, %v84_v7  }
  0x4e   :  { %1015 = vset.pattern.permute.xlu1 %v1189_v16 }
  0x4f   :  { %540 = vperm.xlu1 %1015, %v1219_v2  }
  0x53   :  { %1017 = vset.pattern.permute.xlu1 %v1190_v17 }
  0x54   :  { %812 = vperm.xlu1 %1017, %v1219_v2  }
  0x58   :  { %1019 = vset.pattern.permute.xlu1 %v1181_v8 }
  0x8e   :  { %v1245_v18 = vpop.permute.xlu0 %268 }
  0x8f   :  { %v271_v19 = vmul.f32 %v1245_v18, %v1219_v2 }
  0x91   :  { %274 = vperm.xlu1 %1019, %v271_v19  }
  0x92   :  { %v88_v36 = vpop.permute.xlu0 %87 }
  0x93   :  { %v90_v45 = vmul.f32 %v88_v36, %v1219_v2 }
  0x95   :  { %1020 = vset.pattern.permute.xlu1 %v1189_v16 }
  0x96   :  { %v92_v55 = vpop.permute.xlu0 %91 }
  0x97   :  { %v99_v21 = vpop.permute.xlu1 %98  ;;  %v94_v0 = vmul.f32 %v92_v55, %v1219_v2 }
  0x98   :  { %v101_v46 = vsub.f32 %v1256_v35, %v99_v21  ;;  %v102_v47 = vsub.f32 %v1259_v37, %v99_v21  ;;  %v103_v48 = vsub.f32 %v1261_v38, %v99_v21  ;;  %v1281_v49 = vsub.f32 %v1263_v39, %v99_v21 }
  0x99   :  { %v1284_v50 = vsub.f32 %v1265_v40, %v99_v21  ;;  %v1287_v51 = vsub.f32 %v1270_v42, %v99_v21  ;;  %v1290_v52 = vsub.f32 %v1272_v43, %v99_v21  ;;  %v1293_v53 = vsub.f32 %v1274_v44, %v99_v21 }
  0x9a   :  { %v344_v13 = vmul.f32 %v1245_v18, %v94_v0  ;;  %v125_v27 = vmul.f32 %v1281_v49, %v1281_v49 }
  0x9b   :  { %v1250_v23 = vpop.permute.xlu1 %223  ;;  %v126_v28 = vmul.f32 %v1284_v50, %v1284_v50  ;;  %v127_v29 = vmul.f32 %v1287_v51, %v1287_v51  ;;  %v128_v32 = vmul.f32 %v1290_v52, %v1290_v52  ;;  %v129_v33 = vmul.f32 %v1293_v53, %v1293_v53 }
  0x9c   :  { %v226_v24 = vmul.f32 %v1250_v23, %v1219_v2  ;;  %v301_v12 = vmul.f32 %v1250_v23, %v90_v45  ;;  %v123_v23 = vmul.f32 %v102_v47, %v102_v47 }
  0x9e   :  { %512 = vperm.xlu1 %1020, %v226_v24   ;;  %229 = vperm.xlu0 %1018, %v226_v24  }
  0x9f   :  { %v1254_v31 = vpop.permute.xlu1 %111 }
  0xa0   :  { %v1359_v20 = vadd.f32 %v1254_v31, %v103_v48  ;;  %v1372_v18 = vadd.f32 %v1254_v31, %v1287_v51  ;;  %v1376_v21 = vadd.f32 %v1254_v31, %v1290_v52  ;;  %v1380_v22 = vadd.f32 %v1254_v31, %v1293_v53 }
  0xa2   :  { %1022 = vset.pattern.permute.xlu1 %v1190_v17  ;;  %1021 = vset.pattern.permute.xlu0 %v1187_v14  ;;  %2740 = vst [vmem:[#allocation32_spill] sm:$0xff] %v1359_v20  ;;  %2743 = vst [vmem:[#allocation35_spill] sm:$0xff] %v1372_v18  ;;  %v145_v30 = vmul.f32 %v1359_v20, %v1359_v20 }
  0xa3   :  { %v1268_v41 = vpop.permute.xlu1 %160  ;;  %784 = vperm.xlu1 %1022, %v226_v24   ;;  %552 = vperm.xlu0 %1021, %v271_v19   ;;  %2744 = vst [vmem:[#allocation36_spill] sm:$0xff] %v1376_v21  ;;  %2745 = vst [vmem:[#allocation37_spill] sm:$0xff] %v1380_v22  ;;  %v124_v24 = vmul.f32 %v103_v48, %v103_v48  ;;  %v133_v26 = vpop.permute.xlu0 %132 }
  0xa4   :  { %vm162_vm1 = vcmp.eq.s32.totalorder %v1268_v41, 1  ;;  %v1418_v55 = vadd.f32 %v133_v26, %v126_v28 }
  0xa6   :  { %2750 = vst [vmem:[#allocation42_spill] sm:$0xff] %v1418_v55 }
  0xa7   :  { %1025 = vset.pattern.permute.xlu1 %v1183_v10  ;;  %1023 = vset.pattern.permute.xlu0 %v1188_v15 }
  0xa8   :  { %v213_v54 = vpop.permute.xlu1 %212  ;;  %347 = vperm.xlu1 %1025, %v90_v45   ;;  %824 = vperm.xlu0 %1023, %v271_v19   ;;  %v1353_v19 = vadd.f32 %v1254_v31, %v101_v46 }
  0xa9   :  { %v1297_v56 = vmul.f32 %v213_v54, %v101_v46  ;;  %v1299_v57 = vmul.f32 %v213_v54, %v102_v47  ;;  %v1301_v58 = vmul.f32 %v213_v54, %v103_v48  ;;  %v1304_v59 = vmul.f32 %v213_v54, %v1281_v49 }
  0xaa   :  { %v1307_v60 = vmul.f32 %v213_v54, %v1284_v50  ;;  %v1310_v61 = vmul.f32 %v213_v54, %v1287_v51  ;;  %v1313_v62 = vmul.f32 %v213_v54, %v1290_v52  ;;  %v1316_v63 = vmul.f32 %v213_v54, %v1293_v53  ;;  %2738 = vst [vmem:[#allocation30_spill] sm:$0xff] %v1353_v19 }
  0xab   :  { %2722 = vst [vmem:[#allocation14_spill] sm:$0xff] %v1297_v56  ;;  %2723 = vst [vmem:[#allocation15_spill] sm:$0xff] %v1299_v57  ;;  %v143_v25 = vmul.f32 %v1353_v19, %v1353_v19  ;;  %v1416_v54 = vadd.f32 %v133_v26, %v125_v27 }
  0xac   :  { %2724 = vst [vmem:[#allocation16_spill] sm:$0xff] %v1301_v58  ;;  %2725 = vst [vmem:[#allocation17_spill] sm:$0xff] %v1304_v59  ;;  %1026 = vset.pattern.permute.xlu1 %v1187_v14  ;;  %1024 = vset.pattern.permute.xlu0 %v1181_v8 }
  0xad   :  { %2726 = vst [vmem:[#allocation18_spill] sm:$0xff] %v1307_v60  ;;  %2727 = vst [vmem:[#allocation19_spill] sm:$0xff] %v1310_v61  ;;  %v258_v1 = vpop.permute.xlu1 %257  ;;  %580 = vperm.xlu1 %1026, %v94_v0   ;;  %304 = vperm.xlu0 %1024, %v94_v0  }
  0xae   :  { %2728 = vst [vmem:[#allocation20_spill] sm:$0xff] %v1313_v62  ;;  %2729 = vst [vmem:[#allocation21_spill] sm:$0xff] %v1316_v63  ;;  %v1321_v3 = vmul.f32 %v258_v1, %v101_v46  ;;  %v1323_v4 = vmul.f32 %v258_v1, %v102_v47  ;;  %v1325_v5 = vmul.f32 %v258_v1, %v103_v48  ;;  %v389_v48 = vpop.permute.xlu0 %388 }
  0xaf   :  { %v1328_v6 = vmul.f32 %v258_v1, %v1281_v49  ;;  %v1331_v7 = vmul.f32 %v258_v1, %v1284_v50  ;;  %v1334_v2 = vmul.f32 %v258_v1, %v1287_v51  ;;  %v1337_v9 = vmul.f32 %v258_v1, %v1290_v52  ;;  %2749 = vst [vmem:[#allocation41_spill] sm:$0xff] %v1416_v54 }
  0xb0   :  { %2730 = vst [vmem:[#allocation22_spill] sm:$0xff] %v1321_v3  ;;  %2731 = vst [vmem:[#allocation23_spill] sm:$0xff] %v1323_v4  ;;  %v1340_v11 = vmul.f32 %v258_v1, %v1293_v53  ;;  %v151_v51 = vadd.f32 %v143_v25, %v133_v26  ;;  %v1414_v53 = vadd.f32 %v133_v26, %v124_v24 }
  0xb1   :  { %2732 = vst [vmem:[#allocation24_spill] sm:$0xff] %v1325_v5  ;;  %2733 = vst [vmem:[#allocation25_spill] sm:$0xff] %v1328_v6  ;;  %1028 = vset.pattern.permute.xlu1 %v1188_v15  ;;  %1027 = vset.pattern.permute.xlu0 %v1189_v16  ;;  %v1420_v1 = vadd.f32 %v133_v26, %v127_v29  ;;  %v1432_v24 = vsub.f32 %v1259_v37, %v389_v48 }
  0xb2   :  { %2734 = vst [vmem:[#allocation26_spill] sm:$0xff] %v1331_v7  ;;  %2735 = vst [vmem:[#allocation27_spill] sm:$0xff] %v1334_v2  ;;  %852 = vperm.xlu1 %1028, %v94_v0   ;;  %620 = vperm.xlu0 %1027, %v90_v45   ;;  %v153_v0 = vadd.f32 %v145_v30, %v133_v26  ;;  %v1440_v29 = vsel %vm162_vm1, %v151_v51, 1.0  ;;  %v421_v51 = vpop.permute.xlu0 %420 }
  0xb3   :  { %2736 = vst [vmem:[#allocation28_spill] sm:$0xff] %v1337_v9  ;;  %2737 = vst [vmem:[#allocation29_spill] sm:$0xff] %v1340_v11 }
  0xb4   :  { %2748 = vst [vmem:[#allocation40_spill] sm:$0xff] %v1414_v53  ;;  %2751 = vst [vmem:[#allocation43_spill] sm:$0xff] %v1420_v1 }
  0xb6   :  { %1029 = vset.pattern.permute.xlu1 %v1183_v10  ;;  %1033 = vset.pattern.permute.xlu0 %v1190_v17  ;;  %v1356_v10 = vadd.f32 %v1254_v31, %v102_v47  ;;  %v150_v47 = vmul.f32 %v1380_v22, %v1380_v22 }
  0xb7   :  { %317 = vperm.xlu1 %1029, %v301_v12   ;;  %892 = vperm.xlu0 %1033, %v90_v45   ;;  %v148_v45 = vmul.f32 %v1372_v18, %v1372_v18 }
  0xb8   :  { %2739 = vst [vmem:[#allocation31_spill] sm:$0xff] %v1356_v10  ;;  %v1436_v28 = vadd.f32 %v150_v47, %v133_v26  ;;  %v1468_v47 = vsub.f32 %v1274_v44, %v389_v48 }
  0xba   :  { %2755 = vst [vmem:[#allocation47_spill] sm:$0xff] %v1468_v47  ;;  %v418_v63 = vmul.f32 %v1468_v47, %v1468_v47 }
  0xbb   :  { %1030 = vset.pattern.permute.xlu1 %v1181_v8  ;;  %1036 = vset.pattern.permute.xlu0 %v1188_v15  ;;  %v1363_v8 = vadd.f32 %v1254_v31, %v1281_v49 }
  0xbc   :  { %360 = vperm.xlu1 %1030, %v344_v13  }
  0xbd   :  { %2741 = vst [vmem:[#allocation33_spill] sm:$0xff] %v1363_v8  ;;  %v146_v34 = vmul.f32 %v1363_v8, %v1363_v8 }
  0xc0   :  { %1031 = vset.pattern.permute.xlu1 %v1189_v16  ;;  %v1367_v16 = vadd.f32 %v1254_v31, %v1284_v50  ;;  %v401_v31 = vpop.permute.xlu1 %400  ;;  %v1412_v50 = vadd.f32 %v133_v26, %v123_v23  ;;  %v1429_v23 = vsub.f32 %v1256_v35, %v389_v48 }
  0xc1   :  { %592 = vperm.xlu1 %1031, %v301_v12   ;;  %v1474_v22 = vadd.f32 %v401_v31, %v1432_v24  ;;  %v1512_v58 = vadd.f32 %v401_v31, %v1468_v47 }
  0xc2   :  { %2742 = vst [vmem:[#allocation34_spill] sm:$0xff] %v1367_v16  ;;  %v147_v36 = vmul.f32 %v1367_v16, %v1367_v16  ;;  %2747 = vst [vmem:[#allocation39_spill] sm:$0xff] %v1412_v50 }
  0xc3   :  { %2757 = vst [vmem:[#allocation49_spill] sm:$0xff] %v1474_v22  ;;  %2764 = vst [vmem:[#allocation56_spill] sm:$0xff] %v1512_v58  ;;  %v432_v56 = vmul.f32 %v1474_v22, %v1474_v22 }
  0xc4   :  { %v155_v25 = vadd.f32 %v147_v36, %v133_v26  ;;  %v1459_v36 = vsub.f32 %v1265_v40, %v389_v48 }
  0xc5   :  { %1032 = vset.pattern.permute.xlu1 %v1187_v14  ;;  %v122_v14 = vmul.f32 %v101_v46, %v101_v46  ;;  %v149_v46 = vmul.f32 %v1376_v21, %v1376_v21  ;;  %v440_v22 = vadd.f32 %v432_v56, %v421_v51 }
  0xc6   :  { %632 = vperm.xlu1 %1032, %v344_v13   ;;  %v1503_v60 = vadd.f32 %v401_v31, %v1459_v36 }
  0xc7   :  { %v1410_v49 = vadd.f32 %v133_v26, %v122_v14  ;;  %v1426_v14 = vpop.permute.xlu1 %660  ;;  %v1434_v27 = vadd.f32 %v149_v46, %v133_v26  ;;  %v1465_v46 = vsub.f32 %v1272_v43, %v389_v48 }
  0xc8   :  { %2761 = vst [vmem:[#allocation53_spill] sm:$0xff] %v1503_v60 }
  0xc9   :  { %2746 = vst [vmem:[#allocation38_spill] sm:$0xff] %v1410_v49  ;;  %2754 = vst [vmem:[#allocation46_spill] sm:$0xff] %v1465_v46  ;;  %v417_v19 = vmul.f32 %v1465_v46, %v1465_v46  ;;  %v1509_v59 = vadd.f32 %v401_v31, %v1465_v46 }
  0xca   :  { %1034 = vset.pattern.permute.xlu1 %v1190_v17  ;;  %v144_v17 = vmul.f32 %v1356_v10, %v1356_v10 }
  0xcb   :  { %864 = vperm.xlu1 %1034, %v301_v12   ;;  %v1422_v12 = vadd.f32 %v133_v26, %v128_v32  ;;  %v1447_v32 = vsub.f32 %v1261_v38, %v389_v48  ;;  %v673_v20 = vpop.permute.xlu1 %672  ;;  %2763 = vst [vmem:[#allocation55_spill] sm:$0xff] %v1509_v59  ;;  %v1528_v6 = vadd.f32 %v421_v51, %v417_v19 }
  0xcc   :  { %v152_v52 = vadd.f32 %v144_v17, %v133_v26  ;;  %v156_v17 = vadd.f32 %v148_v45, %v133_v26  ;;  %v1462_v45 = vsub.f32 %v1270_v42, %v389_v48  ;;  %v1548_v19 = vsub.f32 %v1256_v35, %v1426_v14 }
  0xcd   :  { %2752 = vst [vmem:[#allocation44_spill] sm:$0xff] %v1422_v12  ;;  %v413_v21 = vmul.f32 %v1447_v32, %v1447_v32  ;;  %v1491_v10 = vadd.f32 %v401_v31, %v1447_v32  ;;  %2767 = vst [vmem:[#allocation59_spill] sm:$0xff] %v1528_v6 }
  0xce   :  { %v1444_v30 = vsel %vm162_vm1, %v152_v52, 1.0  ;;  %v1471_v52 = vadd.f32 %v401_v31, %v1429_v23  ;;  %v416_v16 = vmul.f32 %v1462_v45, %v1462_v45  ;;  %2768 = vst [vmem:[#allocation60_spill] sm:$0xff] %v1548_v19  ;;  %v1566_v35 = vsel %vm162_vm1, %v156_v17, 1.0 }
  0xcf   :  { %1035 = vset.pattern.permute.xlu1 %v1188_v15  ;;  %v1424_v15 = vadd.f32 %v133_v26, %v129_v33  ;;  %v1450_v33 = vsub.f32 %v1263_v39, %v389_v48  ;;  %v415_v48 = vmul.f32 %v1459_v36, %v1459_v36  ;;  %2758 = vst [vmem:[#allocation50_spill] sm:$0xff] %v1491_v10 }
  0xd0   :  { %904 = vperm.xlu1 %1035, %v344_v13   ;;  %v154_v13 = vadd.f32 %v146_v34, %v133_v26  ;;  %v411_v34 = vmul.f32 %v1429_v23, %v1429_v23  ;;  %v1456_v26 = vsel %vm162_vm1, %v153_v0, 1.0  ;;  %2756 = vst [vmem:[#allocation48_spill] sm:$0xff] %v1471_v52  ;;  %v412_v0 = vmul.f32 %v1432_v24, %v1432_v24 }
  0xd1   :  { %2753 = vst [vmem:[#allocation45_spill] sm:$0xff] %v1424_v15  ;;  %v414_v18 = vmul.f32 %v1450_v33, %v1450_v33  ;;  %v1500_v61 = vadd.f32 %v401_v31, %v1450_v33  ;;  %v1520_v11 = vadd.f32 %v421_v51, %v413_v21  ;;  %v1524_v2 = vadd.f32 %v421_v51, %v415_v48  ;;  %v449_v48 = vpop.permute.xlu1 %448 }
  0xd2   :  { %v1488_v8 = vsel %vm162_vm1, %v154_v13, 1.0  ;;  %v1497_v62 = vadd.f32 %v421_v51, %v411_v34  ;;  %v1506_v13 = vadd.f32 %v401_v31, %v1462_v45  ;;  %v1514_v57 = vadd.f32 %v421_v51, %v412_v0 }
  0xd3   :  { %2760 = vst [vmem:[#allocation52_spill] sm:$0xff] %v1500_v61  ;;  %v431_v34 = vmul.f32 %v1471_v52, %v1471_v52  ;;  %2766 = vst [vmem:[#allocation58_spill] sm:$0xff] %v1520_v11  ;;  %v1522_v9 = vadd.f32 %v421_v51, %v414_v18  ;;  %v1526_v7 = vadd.f32 %v421_v51, %v416_v16  ;;  %v1536_v52 = vsel %vm162_vm1, %v155_v25, 1.0 }
  0xd4   :  { %2759 = vst [vmem:[#allocation51_spill] sm:$0xff] %v1497_v62  ;;  %2762 = vst [vmem:[#allocation54_spill] sm:$0xff] %v1506_v13  ;;  %v1530_v31 = vadd.f32 %v421_v51, %v418_v63  ;;  %v433_v0 = vmul.f32 %v1491_v10, %v1491_v10  ;;  %v434_v21 = vmul.f32 %v1500_v61, %v1500_v61  ;;  %vm450_vm2 = vcmp.eq.s32.totalorder %v449_v48, 1 }
  0xd5   :  { %2765 = vst [vmem:[#allocation57_spill] sm:$0xff] %v1514_v57  ;;  %v435_v18 = vmul.f32 %v1503_v60, %v1503_v60  ;;  %v436_v16 = vmul.f32 %v1506_v13, %v1506_v13  ;;  %v437_v63 = vmul.f32 %v1509_v59, %v1509_v59  ;;  %v438_v25 = vmul.f32 %v1512_v58, %v1512_v58 }
  0xd6   :  { %v439_v10 = vadd.f32 %v431_v34, %v421_v51  ;;  %v1554_v61 = vsub.f32 %v1259_v37, %v1426_v14  ;;  %v1558_v13 = vsub.f32 %v1261_v38, %v1426_v14  ;;  %v1562_v59 = vsub.f32 %v1263_v39, %v1426_v14 }
  0xd7   :  { %v1570_v34 = vsub.f32 %v1265_v40, %v1426_v14  ;;  %v1574_v37 = vsub.f32 %v1270_v42, %v1426_v14  ;;  %v1578_v38 = vsub.f32 %v1272_v43, %v1426_v14  ;;  %v1582_v39 = vsub.f32 %v1274_v44, %v1426_v14 }
  0xd8   :  { %2769 = vst [vmem:[#allocation61_spill] sm:$0xff] %v1554_v61  ;;  %2770 = vst [vmem:[#allocation62_spill] sm:$0xff] %v1558_v13  ;;  %v441_v56 = vadd.f32 %v433_v0, %v421_v51  ;;  %v442_v58 = vadd.f32 %v434_v21, %v421_v51  ;;  %v443_v17 = vadd.f32 %v435_v18, %v421_v51  ;;  %v1605_v0 = vsel %vm450_vm2, %v439_v10, 1.0 }
  0xd9   :  { %2771 = vst [vmem:[#allocation63_spill] sm:$0xff] %v1562_v59  ;;  %2772 = vst [vmem:[#allocation64_spill] sm:$0xff] %v1570_v34  ;;  %v444_v60 = vadd.f32 %v436_v16, %v421_v51  ;;  %v445_v5 = vadd.f32 %v437_v63, %v421_v51  ;;  %v446_v40 = vadd.f32 %v438_v25, %v421_v51  ;;  %v1613_v16 = vsel %vm450_vm2, %v440_v22, 1.0  ;;  %v1615_v63 = vpop.permute.xlu0 %692 }
  0xda   :  { %2773 = vst [vmem:[#allocation65_spill] sm:$0xff] %v1574_v37  ;;  %2774 = vst [vmem:[#allocation66_spill] sm:$0xff] %v1578_v38  ;;  %v683_v4 = vmul.f32 %v1548_v19, %v1548_v19  ;;  %v1587_v42 = vadd.f32 %v673_v20, %v1548_v19  ;;  %v1590_v43 = vadd.f32 %v673_v20, %v1554_v61  ;;  %v1625_v47 = vsel %vm450_vm2, %v441_v56, 1.0 }
  0xdb   :  { %2775 = vst [vmem:[#allocation67_spill] sm:$0xff] %v1582_v39  ;;  %v1593_v3 = vadd.f32 %v673_v20, %v1558_v13  ;;  %v1596_v44 = vadd.f32 %v673_v20, %v1562_v59  ;;  %v1599_v14 = vadd.f32 %v673_v20, %v1570_v34  ;;  %v1602_v51 = vadd.f32 %v673_v20, %v1574_v37 }
  0xdc   :  { %2776 = vst [vmem:[#allocation68_spill] sm:$0xff] %v1587_v42  ;;  %2777 = vst [vmem:[#allocation69_spill] sm:$0xff] %v1590_v43  ;;  %v684_v21 = vmul.f32 %v1554_v61, %v1554_v61  ;;  %v1610_v18 = vadd.f32 %v673_v20, %v1578_v38  ;;  %v685_v25 = vmul.f32 %v1558_v13, %v1558_v13  ;;  %v1632_v46 = vsel %vm450_vm2, %v442_v58, 1.0 }
  0xdd   :  { %2778 = vst [vmem:[#allocation70_spill] sm:$0xff] %v1593_v3  ;;  %2779 = vst [vmem:[#allocation71_spill] sm:$0xff] %v1596_v44  ;;  %v686_v19 = vmul.f32 %v1562_v59, %v1562_v59  ;;  %v1622_v10 = vadd.f32 %v673_v20, %v1582_v39  ;;  %v687_v61 = vmul.f32 %v1570_v34, %v1570_v34  ;;  %v1641_v56 = vsel %vm450_vm2, %v443_v17, 1.0 }
  0xde   :  { %2780 = vst [vmem:[#allocation72_spill] sm:$0xff] %v1599_v14  ;;  %2781 = vst [vmem:[#allocation73_spill] sm:$0xff] %v1602_v51  ;;  %v688_v22 = vmul.f32 %v1574_v37, %v1574_v37  ;;  %v459_v13 = vmul.f32 %v1605_v0, %v1497_v62  ;;  %v689_v59 = vmul.f32 %v1578_v38, %v1578_v38  ;;  %v1652_v62 = vsel %vm450_vm2, %v444_v60, 1.0 }
  0xdf   :  { %2782 = vst [vmem:[#allocation74_spill] sm:$0xff] %v1610_v18  ;;  %2783 = vst [vmem:[#allocation75_spill] sm:$0xff] %v1622_v10  ;;  %v690_v20 = vmul.f32 %v1582_v39, %v1582_v39  ;;  %v460_v34 = vmul.f32 %v1613_v16, %v1514_v57  ;;  %v1646_v37 = vadd.f32 %v1615_v63, %v683_v4  ;;  %v1663_v57 = vsel %vm450_vm2, %v445_v5, 1.0 }
  0xe0   :  { %v1649_v58 = vadd.f32 %v1615_v63, %v684_v21  ;;  %v461_v38 = vmul.f32 %v1625_v47, %v1520_v11  ;;  %v1657_v39 = vadd.f32 %v1615_v63, %v685_v25  ;;  %v1660_v17 = vadd.f32 %v1615_v63, %v686_v19 }
  0xe1   :  { %v1666_v4 = vsel %vm450_vm2, %v446_v40, 1.0  ;;  %v462_v21 = vmul.f32 %v1632_v46, %v1522_v9  ;;  %v1671_v60 = vadd.f32 %v1615_v63, %v687_v61  ;;  %v463_v11 = vmul.f32 %v1641_v56, %v1524_v2 }
  0xe2   :  { %1037 = vrcp.f32 %v459_v13  ;;  %v1676_v25 = vadd.f32 %v1615_v63, %v688_v22  ;;  %v703_v5 = vmul.f32 %v1587_v42, %v1587_v42  ;;  %v464_v19 = vmul.f32 %v1652_v62, %v1526_v7  ;;  %v721_v42 = vpop.permute.xlu1 %720 }
  0xe3   :  { %1039 = vrcp.f32 %v460_v34  ;;  %v704_v48 = vmul.f32 %v1590_v43, %v1590_v43  ;;  %v705_v61 = vmul.f32 %v1593_v3, %v1593_v3  ;;  %v465_v40 = vmul.f32 %v1663_v57, %v1528_v6 }
  0xe4   :  { %v466_v13 = vmul.f32 %v1666_v4, %v1530_v31  ;;  %1041 = vrcp.f32 %v461_v38  ;;  %v706_v22 = vmul.f32 %v1596_v44, %v1596_v44  ;;  %v707_v34 = vmul.f32 %v1599_v14, %v1599_v14 }
  0xe5   :  { %1043 = vrcp.f32 %v462_v21  ;;  %v708_v43 = vmul.f32 %v1602_v51, %v1602_v51  ;;  %v709_v3 = vmul.f32 %v1610_v18, %v1610_v18  ;;  %v710_v6 = vmul.f32 %v1622_v10, %v1622_v10 }
  0xe6   :  { %1045 = vrcp.f32 %v463_v11  ;;  %v711_v38 = vadd.f32 %v703_v5, %v1615_v63  ;;  %v171_v44 = vmul.f32 %v1440_v29, %v1410_v49  ;;  %v712_v21 = vadd.f32 %v704_v48, %v1615_v63 }
  0xe7   :  { %1047 = vrcp.f32 %v464_v19  ;;  %v713_v14 = vadd.f32 %v705_v61, %v1615_v63  ;;  %v172_v51 = vmul.f32 %v1444_v30, %v1412_v50  ;;  %v714_v18 = vadd.f32 %v706_v22, %v1615_v63 }
  0xe8   :  { %1049 = vrcp.f32 %v465_v40  ;;  %vm722_vm3 = vcmp.eq.s32.totalorder %v721_v42, 1  ;;  %v173_v11 = vmul.f32 %v1456_v26, %v1414_v53  ;;  %v715_v5 = vadd.f32 %v707_v34, %v1615_v63 }
  0xe9   :  { %1051 = vrcp.f32 %v466_v13  ;;  %v1714_v19 = vsel %vm162_vm1, %v1434_v27, 1.0  ;;  %v174_v48 = vmul.f32 %v1488_v8, %v1416_v54  ;;  %v716_v61 = vadd.f32 %v708_v43, %v1615_v63 }
  0xea   :  { %v1722_v40 = vsel %vm162_vm1, %v1436_v28, 1.0  ;;  %v175_v13 = vmul.f32 %v1536_v52, %v1418_v55  ;;  %1053 = vrcp.f32 %v171_v44  ;;  %v717_v22 = vadd.f32 %v709_v3, %v1615_v63 }
  0xeb   :  { %v1728_v34 = vsel %vm722_vm3, %v711_v38, 1.0  ;;  %v176_v27 = vmul.f32 %v1566_v35, %v1420_v1  ;;  %1055 = vrcp.f32 %v172_v51  ;;  %v718_v43 = vadd.f32 %v710_v6, %v1615_v63 }
  0xec   :  { %v1734_v10 = vsel %vm722_vm3, %v712_v21, 1.0  ;;  %v177_v41 = vmul.f32 %v1714_v19, %v1422_v12  ;;  %1057 = vrcp.f32 %v173_v11  ;;  %v1739_v28 = vadd.f32 %v1615_v63, %v689_v59 }
  0xed   :  { %v1742_v3 = vsel %vm722_vm3, %v713_v14, 1.0  ;;  %v178_v44 = vmul.f32 %v1722_v40, %v1424_v15  ;;  %1059 = vrcp.f32 %v174_v48  ;;  %v1747_v51 = vadd.f32 %v1615_v63, %v690_v20 }
  0xee   :  { %v1750_v6 = vsel %vm722_vm3, %v714_v18, 1.0  ;;  %v731_v38 = vmul.f32 %v1728_v34, %v1646_v37  ;;  %1061 = vrcp.f32 %v175_v13  ;;  %v1755_v59 = vsel %vm722_vm3, %v715_v5, 1.0  ;;  %v541_v13 = vpop.permute.xlu1 %540 }
  0xef   :  { %2784 = vst [vmem:[#allocation76_spill] sm:$0xff] %v1747_v51  ;;  %v1038_v21 = vpop.eup %1037  ;;  %v1758_v14 = vsel %vm722_vm3, %v716_v61, 1.0  ;;  %v732_v11 = vmul.f32 %v1734_v10, %v1649_v58  ;;  %1063 = vrcp.f32 %v176_v27  ;;  %v1763_v20 = vsel %vm722_vm3, %v717_v22, 1.0 }
  0xf0   :  { %v1040_v63 = vpop.eup %1039  ;;  %v1766_v18 = vsel %vm722_vm3, %v718_v43, 1.0  ;;  %v733_v48 = vmul.f32 %v1742_v3, %v1657_v39  ;;  %1065 = vrcp.f32 %v177_v41  ;;  %v734_v61 = vmul.f32 %v1750_v6, %v1660_v17 }
  0xf1   :  { %v1042_v5 = vpop.eup %1041  ;;  %1067 = vrcp.f32 %v178_v44  ;;  %v735_v27 = vmul.f32 %v1755_v59, %v1671_v60  ;;  %v736_v22 = vmul.f32 %v1758_v14, %v1676_v25  ;;  %v1777_v42 = vmul.f32 %v541_v13, %v1429_v23 }
  0xf2   :  { %v1044_v15 = vpop.eup %1043  ;;  %1069 = vrcp.f32 %v731_v38  ;;  %v737_v41 = vmul.f32 %v1763_v20, %v1739_v28  ;;  %v738_v12 = vmul.f32 %v1766_v18, %v1747_v51  ;;  %v1784_v44 = vmul.f32 %v541_v13, %v1432_v24 }
  0xf3   :  { %2785 = vst [vmem:[#allocation77_spill] sm:$0xff] %v1777_v42  ;;  %v1046_v43 = vpop.eup %1045  ;;  %1071 = vrcp.f32 %v732_v11  ;;  %v1787_v55 = vmul.f32 %v541_v13, %v1447_v32  ;;  %v1790_v38 = vmul.f32 %v541_v13, %v1450_v33  ;;  %v1793_v42 = vmul.f32 %v541_v13, %v1459_v36  ;;  %v2791_v11 = vld [vmem:[#allocation46_spill] sm:$0xff] }
  0xf4   :  { %2786 = vst [vmem:[#allocation78_spill] sm:$0xff] %v1784_v44  ;;  %v1048_v1 = vpop.eup %1047  ;;  %1073 = vrcp.f32 %v733_v48  ;;  %v1796_v53 = vmul.f32 %v541_v13, %v1462_v45  ;;  %v1799_v50 = vmul.f32 %v541_v13, %v2791_v11  ;;  %v2793_v44 = vld [vmem:[#allocation47_spill] sm:$0xff]  ;;  %v501_v48 = vpop.permute.xlu0 %500 }
  0xf5   :  { %2787 = vst [vmem:[#allocation79_spill] sm:$0xff] %v1787_v55  ;;  %2788 = vst [vmem:[#allocation80_spill] sm:$0xff] %v1790_v38  ;;  %v1050_v54 = vpop.eup %1049  ;;  %1075 = vrcp.f32 %v734_v61  ;;  %v1802_v49 = vmul.f32 %v541_v13, %v2793_v44  ;;  %v1805_v55 = vmul.f32 %v1038_v21, %v1605_v0  ;;  %v1808_v38 = vmul.f32 %v501_v48, %v1429_v23  ;;  %v2798_v13 = vld [vmem:[#allocation51_spill] sm:$0xff] }
  0xf6   :  { %2789 = vst [vmem:[#allocation81_spill] sm:$0xff] %v1793_v42  ;;  %2790 = vst [vmem:[#allocation82_spill] sm:$0xff] %v1796_v53  ;;  %v1052_v51 = vpop.eup %1051  ;;  %v1811_v42 = vmul.f32 %v501_v48, %v1432_v24  ;;  %v1814_v61 = vmul.f32 %v501_v48, %v1447_v32  ;;  %1077 = vrcp.f32 %v735_v27  ;;  %v1825_v0 = vmul.f32 %v501_v48, %v1450_v33  ;;  %v2804_v33 = vld [vmem:[#allocation58_spill] sm:$0xff] }
  0xf7   :  { %2792 = vst [vmem:[#allocation46_spill] sm:$0xff] %v1799_v50  ;;  %2794 = vst [vmem:[#allocation47_spill] sm:$0xff] %v1802_v49  ;;  %v1816_v53 = vpop.eup %1053  ;;  %v1819_v50 = vmul.f32 %v1040_v63, %v1613_v16  ;;  %v1822_v49 = vmul.f32 %v1038_v21, %v2798_v13  ;;  %v1830_v24 = vmul.f32 %v1042_v5, %v1625_v47  ;;  %1079 = vrcp.f32 %v736_v22  ;;  %v813_v16 = vpop.permute.xlu1 %812 }
  0xf8   :  { %2795 = vst [vmem:[#allocation83_spill] sm:$0xff] %v1805_v55  ;;  %2796 = vst [vmem:[#allocation84_spill] sm:$0xff] %v1814_v61  ;;  %v1827_v23 = vpop.eup %1055  ;;  %v2801_v55 = vld [vmem:[#allocation57_spill] sm:$0xff]  ;;  %v1836_v61 = vmul.f32 %v501_v48, %v1459_v36  ;;  %v1841_v21 = vmul.f32 %v1044_v15, %v1632_v46  ;;  %v1844_v27 = vmul.f32 %v1042_v5, %v2804_v33  ;;  %1081 = vrcp.f32 %v737_v41  ;;  %v2818_v33 = vld [vmem:[#allocation62_spill] sm:$0xff] }
  0xf9   :  { %2797 = vst [vmem:[#allocation85_spill] sm:$0xff] %v1819_v50  ;;  %2799 = vst [vmem:[#allocation51_spill] sm:$0xff] %v1822_v49  ;;  %v1833_v32 = vmul.f32 %v1040_v63, %v2801_v55  ;;  %v1838_v50 = vpop.eup %1057  ;;  %v1847_v47 = vmul.f32 %v501_v48, %v1462_v45  ;;  %v1852_v55 = vmul.f32 %v1046_v43, %v1641_v56  ;;  %1083 = vrcp.f32 %v738_v12  ;;  %v2812_v56 = vld [vmem:[#allocation60_spill] sm:$0xff]  ;;  %v2828_v49 = vld [vmem:[#allocation65_spill] sm:$0xff] }
  0xfa   :  { %2800 = vst [vmem:[#allocation86_spill] sm:$0xff] %v1830_v24  ;;  %2803 = vst [vmem:[#allocation87_spill] sm:$0xff] %v1841_v21  ;;  %v1849_v13 = vpop.eup %1059  ;;  %v1855_v36 = vmul.f32 %v1044_v15, %v1522_v9  ;;  %v1858_v63 = vmul.f32 %v501_v48, %v2791_v11  ;;  %v1863_v5 = vmul.f32 %v1048_v1, %v1652_v62  ;;  %v2816_v11 = vld [vmem:[#allocation61_spill] sm:$0xff]  ;;  %v2844_v21 = vld [vmem:[#allocation28_spill] sm:$0xff] }
  0xfb   :  { %2802 = vst [vmem:[#allocation57_spill] sm:$0xff] %v1833_v32  ;;  %2805 = vst [vmem:[#allocation58_spill] sm:$0xff] %v1844_v27  ;;  %v1860_v46 = vpop.eup %1061  ;;  %v1866_v45 = vmul.f32 %v1046_v43, %v1524_v2  ;;  %v1869_v22 = vmul.f32 %v501_v48, %v2793_v44  ;;  %v1872_v41 = vmul.f32 %v813_v16, %v2812_v56  ;;  %v773_v43 = vpop.permute.xlu0 %772  ;;  %v2845_v24 = vld [vmem:[#allocation29_spill] sm:$0xff] }
  0xfc   :  { %2806 = vst [vmem:[#allocation88_spill] sm:$0xff] %v1852_v55  ;;  %2807 = vst [vmem:[#allocation89_spill] sm:$0xff] %v1855_v36  ;;  %v1874_v9 = vpop.eup %1063  ;;  %v1877_v12 = vmul.f32 %v1050_v54, %v1663_v57  ;;  %v1880_v15 = vmul.f32 %v1048_v1, %v1526_v7  ;;  %v1883_v62 = vmul.f32 %v813_v16, %v2816_v11  ;;  %v2823_v57 = vld [vmem:[#allocation63_spill] sm:$0xff]  ;;  %v2825_v7 = vld [vmem:[#allocation64_spill] sm:$0xff] }
  0xfd   :  { %2808 = vst [vmem:[#allocation90_spill] sm:$0xff] %v1858_v63  ;;  %2809 = vst [vmem:[#allocation91_spill] sm:$0xff] %v1863_v5  ;;  %v1886_v2 = vmul.f32 %v813_v16, %v2818_v33  ;;  %v1888_v44 = vpop.eup %1065  ;;  %v1891_v48 = vmul.f32 %v1052_v51, %v1666_v4  ;;  %v1897_v27 = vmul.f32 %v813_v16, %v2823_v57  ;;  %v2843_v5 = vld [vmem:[#allocation27_spill] sm:$0xff] }
  0xfe   :  { %2810 = vst [vmem:[#allocation92_spill] sm:$0xff] %v1866_v45  ;;  %2811 = vst [vmem:[#allocation93_spill] sm:$0xff] %v1869_v22  ;;  %v2821_v45 = vld [vmem:[#allocation59_spill] sm:$0xff]  ;;  %v1900_v1 = vmul.f32 %v813_v16, %v2825_v7  ;;  %v1905_v32 = vmul.f32 %v1052_v51, %v1530_v31  ;;  %v1926_v31 = vmul.f32 %v773_v43, %v2823_v57 }
  0xff   :  { %2813 = vst [vmem:[#allocation60_spill] sm:$0xff] %v1872_v41  ;;  %2814 = vst [vmem:[#allocation94_spill] sm:$0xff] %v1877_v12  ;;  %v1894_v36 = vmul.f32 %v1050_v54, %v2821_v45  ;;  %v2832_v41 = vld [vmem:[#allocation67_spill] sm:$0xff]  ;;  %v2842_v12 = vld [vmem:[#allocation26_spill] sm:$0xff] }
 0x100   :  { %2815 = vst [vmem:[#allocation95_spill] sm:$0xff] %v1880_v15  ;;  %2817 = vst [vmem:[#allocation61_spill] sm:$0xff] %v1883_v62  ;;  %v1902_v15 = vpop.eup %1067  ;;  %v2830_v62 = vld [vmem:[#allocation66_spill] sm:$0xff]  ;;  %v1914_v54 = vmul.f32 %v813_v16, %v2832_v41 }
 0x101   :  { %2819 = vst [vmem:[#allocation62_spill] sm:$0xff] %v1886_v2  ;;  %2820 = vst [vmem:[#allocation96_spill] sm:$0xff] %v1891_v48  ;;  %v1908_v2 = vmul.f32 %v813_v16, %v2828_v49  ;;  %v1911_v4 = vmul.f32 %v813_v16, %v2830_v62  ;;  %v1070_v45 = vpop.eup %1069  ;;  %v1934_v16 = vmul.f32 %v1827_v23, %v1444_v30 }
 0x102   :  { %2822 = vst [vmem:[#allocation59_spill] sm:$0xff] %v1894_v36  ;;  %2824 = vst [vmem:[#allocation63_spill] sm:$0xff] %v1897_v27  ;;  %v1917_v36 = vmul.f32 %v773_v43, %v2812_v56  ;;  %v1923_v27 = vmul.f32 %v773_v43, %v2818_v33  ;;  %v1072_v51 = vpop.eup %1071  ;;  %v1938_v56 = vmul.f32 %v1838_v50, %v1456_v26 }
 0x103   :  { %2826 = vst [vmem:[#allocation64_spill] sm:$0xff] %v1900_v1  ;;  %2827 = vst [vmem:[#allocation97_spill] sm:$0xff] %v1905_v32  ;;  %v1920_v1 = vmul.f32 %v773_v43, %v2816_v11  ;;  %v1930_v32 = vmul.f32 %v1816_v53, %v1440_v29  ;;  %v1942_v11 = vmul.f32 %v1849_v13, %v1488_v8  ;;  %v1074_v33 = vpop.eup %1073 }
 0x104   :  { %2829 = vst [vmem:[#allocation65_spill] sm:$0xff] %v1908_v2  ;;  %2831 = vst [vmem:[#allocation66_spill] sm:$0xff] %v1911_v4  ;;  %v1950_v29 = vmul.f32 %v1874_v9, %v1566_v35  ;;  %v1954_v30 = vmul.f32 %v1888_v44, %v1714_v19  ;;  %v1958_v26 = vmul.f32 %v1902_v15, %v1722_v40  ;;  %v1076_v8 = vpop.eup %1075  ;;  %v2838_v4 = vld [vmem:[#allocation22_spill] sm:$0xff] }
 0x105   :  { %2833 = vst [vmem:[#allocation67_spill] sm:$0xff] %v1914_v54  ;;  %2834 = vst [vmem:[#allocation98_spill] sm:$0xff] %v1917_v36  ;;  %v1946_v54 = vmul.f32 %v1860_v46, %v1536_v52  ;;  %v2841_v36 = vld [vmem:[#allocation25_spill] sm:$0xff]  ;;  %v1078_v63 = vpop.eup %1077 }
 0x106   :  { %2835 = vst [vmem:[#allocation99_spill] sm:$0xff] %v1920_v1  ;;  %2836 = vst [vmem:[#allocation100_spill] sm:$0xff] %v1923_v27  ;;  %v2840_v1 = vld [vmem:[#allocation24_spill] sm:$0xff] }
 0x107   :  { %2837 = vst [vmem:[#allocation101_spill] sm:$0xff] %v1926_v31  ;;  %v2839_v31 = vld [vmem:[#allocation23_spill] sm:$0xff] }
 0x10c   :  { %v275_v57 = vpop.permute.xlu1 %274 }
 0x10d   :  { %v277_v2 = vadd.f32 %v275_v57, %v2838_v4  ;;  %v278_v27 = vadd.f32 %v275_v57, %v2839_v31  ;;  %v279_v52 = vadd.f32 %v275_v57, %v2840_v1  ;;  %v280_v48 = vadd.f32 %v275_v57, %v2841_v36 }
 0x10e   :  { %v281_v35 = vadd.f32 %v275_v57, %v2842_v12  ;;  %v282_v55 = vadd.f32 %v275_v57, %v2843_v5  ;;  %v283_v19 = vadd.f32 %v275_v57, %v2844_v21  ;;  %v284_v22 = vadd.f32 %v275_v57, %v2845_v24  ;;  %v1080_v12 = vpop.eup %1079 }
 0x10f   :  { %v1969_v40 = vmul.f32 %v277_v2, %v1930_v32  ;;  %v1972_v4 = vmul.f32 %v278_v27, %v1934_v16  ;;  %v1975_v31 = vmul.f32 %v279_v52, %v1938_v56  ;;  %v1978_v36 = vmul.f32 %v280_v48, %v1942_v11  ;;  %v1082_v27 = vpop.eup %1081 }
 0x110   :  { %v1981_v5 = vmul.f32 %v281_v35, %v1946_v54  ;;  %v1984_v21 = vmul.f32 %v282_v55, %v1950_v29  ;;  %v1987_v24 = vmul.f32 %v283_v19, %v1954_v30  ;;  %v1990_v2 = vmul.f32 %v284_v22, %v1958_v26  ;;  %v1084_v55 = vpop.eup %1083 }
 0x111   :  { %v1993_v1 = vmul.f32 %v1070_v45, %v1728_v34  ;;  %v1996_v48 = vmul.f32 %v773_v43, %v2825_v7  ;;  %v1999_v57 = vmul.f32 %v773_v43, %v2828_v49  ;;  %v2002_v52 = vmul.f32 %v773_v43, %v2830_v62 }
 0x112   :  { %2846 = vst [vmem:[#allocation22_spill] sm:$0xff] %v1981_v5  ;;  %2847 = vst [vmem:[#allocation23_spill] sm:$0xff] %v1984_v21  ;;  %v2005_v35 = vmul.f32 %v1072_v51, %v1734_v10  ;;  %v2008_v22 = vmul.f32 %v1074_v33, %v1742_v3  ;;  %v2011_v19 = vmul.f32 %v1076_v8, %v1750_v6 }
 0x113   :  { %2848 = vst [vmem:[#allocation24_spill] sm:$0xff] %v1987_v24  ;;  %2849 = vst [vmem:[#allocation25_spill] sm:$0xff] %v1990_v2  ;;  %v2014_v34 = vmul.f32 %v773_v43, %v2832_v41  ;;  %v2017_v7 = vmul.f32 %v1078_v63, %v1755_v59  ;;  %v2020_v49 = vmul.f32 %v1080_v12, %v1758_v14  ;;  %v2937_v24 = vld [vmem:[#allocation67_spill] sm:$0xff] }
 0x114   :  { %v2023_v62 = vmul.f32 %v1070_v45, %v1646_v37  ;;  %v2026_v10 = vmul.f32 %v1072_v51, %v1649_v58  ;;  %v2029_v3 = vmul.f32 %v1082_v27, %v1763_v20  ;;  %v2032_v6 = vmul.f32 %v1074_v33, %v1657_v39  ;;  %v2857_v20 = vld [vmem:[#allocation76_spill] sm:$0xff]  ;;  %v2859_v39 = vld [vmem:[#allocation38_spill] sm:$0xff] }
 0x115   :  { %v2035_v41 = vmul.f32 %v1076_v8, %v1660_v17  ;;  %v2038_v59 = vmul.f32 %v1078_v63, %v1671_v60  ;;  %v2041_v14 = vmul.f32 %v1084_v55, %v1766_v18  ;;  %v2044_v37 = vmul.f32 %v1080_v12, %v1676_v25  ;;  %v2860_v17 = vld [vmem:[#allocation39_spill] sm:$0xff]  ;;  %v2861_v63 = vld [vmem:[#allocation40_spill] sm:$0xff]  ;;  %v2862_v25 = vld [vmem:[#allocation41_spill] sm:$0xff] }
 0x116   :  { %2850 = vst [vmem:[#allocation26_spill] sm:$0xff] %v2023_v62  ;;  %2851 = vst [vmem:[#allocation27_spill] sm:$0xff] %v2026_v10  ;;  %v2047_v58 = vmul.f32 %v1082_v27, %v1739_v28  ;;  %v2050_v43 = vmul.f32 %v1084_v55, %v2857_v20  ;;  %v2054_v45 = vmul.f32 %v1816_v53, %v2859_v39  ;;  %v2863_v28 = vld [vmem:[#allocation42_spill] sm:$0xff]  ;;  %v2864_v8 = vld [vmem:[#allocation43_spill] sm:$0xff] }
 0x117   :  { %2852 = vst [vmem:[#allocation28_spill] sm:$0xff] %v2032_v6  ;;  %2853 = vst [vmem:[#allocation29_spill] sm:$0xff] %v2035_v41  ;;  %v2058_v60 = vmul.f32 %v1827_v23, %v2860_v17  ;;  %v2062_v18 = vmul.f32 %v1838_v50, %v2861_v63  ;;  %v2066_v51 = vmul.f32 %v1849_v13, %v2862_v25  ;;  %v2865_v12 = vld [vmem:[#allocation44_spill] sm:$0xff]  ;;  %v2866_v27 = vld [vmem:[#allocation45_spill] sm:$0xff] }
 0x118   :  { %2854 = vst [vmem:[#allocation102_spill] sm:$0xff] %v2038_v59  ;;  %2855 = vst [vmem:[#allocation103_spill] sm:$0xff] %v2044_v37  ;;  %v2070_v33 = vmul.f32 %v1860_v46, %v2863_v28  ;;  %v2074_v53 = vmul.f32 %v1874_v9, %v2864_v8  ;;  %v2078_v23 = vmul.f32 %v1888_v44, %v2865_v12  ;;  %v2867_v28 = vld [vmem:[#allocation84_spill] sm:$0xff]  ;;  %v2868_v39 = vld [vmem:[#allocation90_spill] sm:$0xff] }
 0x119   :  { %2856 = vst [vmem:[#allocation104_spill] sm:$0xff] %v2047_v58  ;;  %2858 = vst [vmem:[#allocation76_spill] sm:$0xff] %v2050_v43  ;;  %v2082_v50 = vmul.f32 %v1902_v15, %v2866_v27  ;;  %v513_v63 = vpop.permute.xlu1 %512  ;;  %v2869_v9 = vld [vmem:[#allocation93_spill] sm:$0xff]  ;;  %v230_v17 = vpop.permute.xlu0 %229  ;;  %v2870_v55 = vld [vmem:[#allocation83_spill] sm:$0xff] }
 0x11a   :  { %v515_v15 = vsub.f32 %v1808_v38, %v513_v63  ;;  %v516_v25 = vsub.f32 %v1811_v42, %v513_v63  ;;  %v517_v8 = vsub.f32 %v2867_v28, %v513_v63  ;;  %v518_v12 = vsub.f32 %v1825_v0, %v513_v63  ;;  %v2872_v43 = vld [vmem:[#allocation85_spill] sm:$0xff]  ;;  %v2874_v42 = vld [vmem:[#allocation86_spill] sm:$0xff]  ;;  %v2876_v28 = vld [vmem:[#allocation87_spill] sm:$0xff] }
 0x11b   :  { %v519_v27 = vsub.f32 %v1836_v61, %v513_v63  ;;  %v520_v46 = vsub.f32 %v1847_v47, %v513_v63  ;;  %v521_v20 = vsub.f32 %v2868_v39, %v513_v63  ;;  %v522_v13 = vsub.f32 %v2869_v9, %v513_v63  ;;  %v2878_v61 = vld [vmem:[#allocation88_spill] sm:$0xff]  ;;  %v2880_v47 = vld [vmem:[#allocation91_spill] sm:$0xff]  ;;  %v2882_v9 = vld [vmem:[#allocation94_spill] sm:$0xff] }
 0x11c   :  { %v2101_v44 = vmul.f32 %v515_v15, %v2870_v55  ;;  %v2104_v38 = vmul.f32 %v516_v25, %v2872_v43  ;;  %v2107_v58 = vmul.f32 %v517_v8, %v2874_v42  ;;  %v2110_v0 = vmul.f32 %v518_v12, %v2876_v28  ;;  %v2884_v15 = vld [vmem:[#allocation96_spill] sm:$0xff]  ;;  %v2886_v25 = vld [vmem:[#allocation14_spill] sm:$0xff]  ;;  %v2887_v6 = vld [vmem:[#allocation15_spill] sm:$0xff] }
 0x11d   :  { %v2113_v37 = vmul.f32 %v519_v27, %v2878_v61  ;;  %v2116_v39 = vmul.f32 %v520_v46, %v2880_v47  ;;  %v2119_v63 = vmul.f32 %v521_v20, %v2882_v9  ;;  %v2122_v59 = vmul.f32 %v522_v13, %v2884_v15  ;;  %v2888_v10 = vld [vmem:[#allocation16_spill] sm:$0xff]  ;;  %v2889_v12 = vld [vmem:[#allocation17_spill] sm:$0xff] }
 0x11e   :  { %2871 = vst [vmem:[#allocation38_spill] sm:$0xff] %v2101_v44  ;;  %2873 = vst [vmem:[#allocation39_spill] sm:$0xff] %v2104_v38  ;;  %v232_v41 = vsub.f32 %v2886_v25, %v230_v17  ;;  %v233_v8 = vsub.f32 %v2887_v6, %v230_v17  ;;  %v234_v62 = vsub.f32 %v2888_v10, %v230_v17  ;;  %v2892_v46 = vld [vmem:[#allocation20_spill] sm:$0xff]  ;;  %v2893_v44 = vld [vmem:[#allocation21_spill] sm:$0xff] }
 0x11f   :  { %2875 = vst [vmem:[#allocation40_spill] sm:$0xff] %v2107_v58  ;;  %2877 = vst [vmem:[#allocation41_spill] sm:$0xff] %v2110_v0  ;;  %v235_v0 = vsub.f32 %v2889_v12, %v230_v17  ;;  %v2890_v58 = vld [vmem:[#allocation18_spill] sm:$0xff]  ;;  %v239_v20 = vsub.f32 %v2893_v44, %v230_v17 }
 0x120   :  { %2879 = vst [vmem:[#allocation42_spill] sm:$0xff] %v2113_v37  ;;  %2881 = vst [vmem:[#allocation43_spill] sm:$0xff] %v2116_v39  ;;  %v236_v27 = vsub.f32 %v2890_v58, %v230_v17  ;;  %v2891_v37 = vld [vmem:[#allocation19_spill] sm:$0xff]  ;;  %v238_v39 = vsub.f32 %v2892_v46, %v230_v17  ;;  %v2133_v13 = vmul.f32 %v232_v41, %v1930_v32  ;;  %v2894_v41 = vld [vmem:[#allocation98_spill] sm:$0xff] }
 0x121   :  { %2883 = vst [vmem:[#allocation44_spill] sm:$0xff] %v2119_v63  ;;  %2885 = vst [vmem:[#allocation45_spill] sm:$0xff] %v2122_v59  ;;  %v237_v38 = vsub.f32 %v2891_v37, %v230_v17  ;;  %v785_v63 = vpop.permute.xlu1 %784  ;;  %v2136_v25 = vmul.f32 %v233_v8, %v1934_v16  ;;  %v2139_v6 = vmul.f32 %v234_v62, %v1938_v56  ;;  %v553_v16 = vpop.permute.xlu0 %552  ;;  %v2895_v56 = vld [vmem:[#allocation99_spill] sm:$0xff]  ;;  %v2896_v8 = vld [vmem:[#allocation100_spill] sm:$0xff] }
 0x122   :  { %v2142_v10 = vmul.f32 %v235_v0, %v1942_v11  ;;  %v2145_v58 = vmul.f32 %v236_v27, %v1946_v54  ;;  %v2151_v17 = vmul.f32 %v238_v39, %v1954_v30  ;;  %v2154_v32 = vmul.f32 %v239_v20, %v1958_v26  ;;  %v2897_v0 = vld [vmem:[#allocation101_spill] sm:$0xff]  ;;  %v2936_v59 = vld [vmem:[#allocation66_spill] sm:$0xff] }
 0x123   :  { %v2148_v37 = vmul.f32 %v237_v38, %v1950_v29  ;;  %v787_v44 = vsub.f32 %v2894_v41, %v785_v63  ;;  %v788_v62 = vsub.f32 %v2895_v56, %v785_v63  ;;  %v789_v11 = vsub.f32 %v2896_v8, %v785_v63 }
 0x124   :  { %v790_v12 = vsub.f32 %v2897_v0, %v785_v63  ;;  %v791_v54 = vsub.f32 %v1996_v48, %v785_v63  ;;  %v792_v29 = vsub.f32 %v1999_v57, %v785_v63  ;;  %v793_v38 = vsub.f32 %v2002_v52, %v785_v63 }
 0x125   :  { %v794_v30 = vsub.f32 %v2014_v34, %v785_v63  ;;  %v2165_v26 = vmul.f32 %v787_v44, %v1993_v1  ;;  %v2168_v39 = vmul.f32 %v788_v62, %v2005_v35  ;;  %v2171_v27 = vmul.f32 %v789_v11, %v2008_v22  ;;  %v348_v20 = vpop.permute.xlu1 %347  ;;  %v2906_v63 = vld [vmem:[#allocation77_spill] sm:$0xff]  ;;  %v2907_v44 = vld [vmem:[#allocation78_spill] sm:$0xff]  ;;  %v2908_v62 = vld [vmem:[#allocation79_spill] sm:$0xff] }
 0x126   :  { %v2174_v46 = vmul.f32 %v790_v12, %v2011_v19  ;;  %v2177_v48 = vmul.f32 %v791_v54, %v2017_v7  ;;  %v2180_v57 = vmul.f32 %v792_v29, %v2020_v49  ;;  %v2183_v52 = vmul.f32 %v793_v38, %v2029_v3  ;;  %v2909_v11 = vld [vmem:[#allocation80_spill] sm:$0xff]  ;;  %v2910_v12 = vld [vmem:[#allocation81_spill] sm:$0xff]  ;;  %v2912_v29 = vld [vmem:[#allocation46_spill] sm:$0xff] }
 0x127   :  { %2898 = vst [vmem:[#allocation84_spill] sm:$0xff] %v2165_v26  ;;  %2899 = vst [vmem:[#allocation90_spill] sm:$0xff] %v2168_v39  ;;  %v2186_v34 = vmul.f32 %v794_v30, %v2041_v14  ;;  %v555_v41 = vadd.f32 %v553_v16, %v2906_v63  ;;  %v556_v56 = vadd.f32 %v553_v16, %v2907_v44  ;;  %v2931_v39 = vld [vmem:[#allocation61_spill] sm:$0xff] }
 0x128   :  { %2900 = vst [vmem:[#allocation93_spill] sm:$0xff] %v2171_v27  ;;  %2901 = vst [vmem:[#allocation83_spill] sm:$0xff] %v2174_v46  ;;  %v557_v8 = vadd.f32 %v553_v16, %v2908_v62  ;;  %v558_v0 = vadd.f32 %v553_v16, %v2909_v11  ;;  %v559_v54 = vadd.f32 %v553_v16, %v2910_v12  ;;  %v2913_v27 = vld [vmem:[#allocation47_spill] sm:$0xff] }
 0x129   :  { %2902 = vst [vmem:[#allocation85_spill] sm:$0xff] %v2177_v48  ;;  %2903 = vst [vmem:[#allocation86_spill] sm:$0xff] %v2180_v57  ;;  %v2911_v48 = vld [vmem:[#allocation82_spill] sm:$0xff]  ;;  %v561_v57 = vadd.f32 %v553_v16, %v2912_v29  ;;  %v562_v38 = vadd.f32 %v553_v16, %v2913_v27  ;;  %v2197_v30 = vmul.f32 %v555_v41, %v2870_v55 }
 0x12a   :  { %2904 = vst [vmem:[#allocation87_spill] sm:$0xff] %v2183_v52  ;;  %2905 = vst [vmem:[#allocation88_spill] sm:$0xff] %v2186_v34  ;;  %v560_v46 = vadd.f32 %v553_v16, %v2911_v48  ;;  %v825_v52 = vpop.permute.xlu0 %824  ;;  %v2200_v63 = vmul.f32 %v556_v56, %v2872_v43  ;;  %v2203_v44 = vmul.f32 %v557_v8, %v2874_v42  ;;  %v581_v43 = vpop.permute.xlu1 %580  ;;  %v2922_v27 = vld [vmem:[#allocation30_spill] sm:$0xff]  ;;  %v2923_v42 = vld [vmem:[#allocation31_spill] sm:$0xff] }
 0x12b   :  { %2914 = vst [vmem:[#allocation91_spill] sm:$0xff] %v2197_v30  ;;  %v2206_v62 = vmul.f32 %v558_v0, %v2876_v28  ;;  %v2209_v11 = vmul.f32 %v559_v54, %v2878_v61  ;;  %v2215_v16 = vmul.f32 %v561_v57, %v2882_v9  ;;  %v2218_v55 = vmul.f32 %v562_v38, %v2884_v15  ;;  %v2924_v28 = vld [vmem:[#allocation32_spill] sm:$0xff]  ;;  %v2925_v61 = vld [vmem:[#allocation33_spill] sm:$0xff]  ;;  %v2927_v9 = vld [vmem:[#allocation35_spill] sm:$0xff] }
 0x12c   :  { %2915 = vst [vmem:[#allocation94_spill] sm:$0xff] %v2200_v63  ;;  %2916 = vst [vmem:[#allocation96_spill] sm:$0xff] %v2203_v44  ;;  %v2212_v48 = vmul.f32 %v560_v46, %v2880_v47  ;;  %v2221_v41 = vmul.f32 %v348_v20, %v2922_v27  ;;  %v2224_v56 = vmul.f32 %v348_v20, %v2923_v42  ;;  %v2926_v47 = vld [vmem:[#allocation34_spill] sm:$0xff]  ;;  %v2928_v15 = vld [vmem:[#allocation36_spill] sm:$0xff] }
 0x12d   :  { %2917 = vst [vmem:[#allocation14_spill] sm:$0xff] %v2206_v62  ;;  %2918 = vst [vmem:[#allocation15_spill] sm:$0xff] %v2209_v11  ;;  %v2227_v8 = vmul.f32 %v348_v20, %v2924_v28  ;;  %v2230_v0 = vmul.f32 %v348_v20, %v2925_v61  ;;  %v2233_v46 = vmul.f32 %v348_v20, %v2926_v47  ;;  %v2929_v54 = vld [vmem:[#allocation37_spill] sm:$0xff]  ;;  %v2930_v38 = vld [vmem:[#allocation60_spill] sm:$0xff] }
 0x12e   :  { %2919 = vst [vmem:[#allocation16_spill] sm:$0xff] %v2212_v48  ;;  %2920 = vst [vmem:[#allocation17_spill] sm:$0xff] %v2215_v16  ;;  %v2236_v57 = vmul.f32 %v348_v20, %v2927_v9  ;;  %v2239_v12 = vmul.f32 %v348_v20, %v2928_v15  ;;  %v2242_v29 = vmul.f32 %v348_v20, %v2929_v54  ;;  %v2933_v48 = vld [vmem:[#allocation63_spill] sm:$0xff]  ;;  %v2934_v62 = vld [vmem:[#allocation64_spill] sm:$0xff]  ;;  %v305_v5 = vpop.permute.xlu0 %304 }
 0x12f   :  { %2921 = vst [vmem:[#allocation18_spill] sm:$0xff] %v2218_v55  ;;  %v827_v34 = vadd.f32 %v825_v52, %v2930_v38  ;;  %v828_v26 = vadd.f32 %v825_v52, %v2931_v39  ;;  %v2932_v55 = vld [vmem:[#allocation62_spill] sm:$0xff]  ;;  %v830_v11 = vadd.f32 %v825_v52, %v2933_v48  ;;  %v831_v44 = vadd.f32 %v825_v52, %v2934_v62  ;;  %v2935_v63 = vld [vmem:[#allocation65_spill] sm:$0xff] }
 0x130   :  { %v829_v16 = vadd.f32 %v825_v52, %v2932_v55  ;;  %v832_v30 = vadd.f32 %v825_v52, %v2935_v63  ;;  %v833_v2 = vadd.f32 %v825_v52, %v2936_v59  ;;  %v834_v21 = vadd.f32 %v825_v52, %v2937_v24 }
 0x131   :  { %v2253_v20 = vmul.f32 %v827_v34, %v1993_v1  ;;  %v2256_v38 = vmul.f32 %v828_v26, %v2005_v35  ;;  %v2262_v48 = vmul.f32 %v830_v11, %v2011_v19  ;;  %v2265_v62 = vmul.f32 %v831_v44, %v2017_v7  ;;  %v853_v35 = vpop.permute.xlu1 %852  ;;  %v2946_v26 = vld [vmem:[#allocation48_spill] sm:$0xff]  ;;  %v2948_v19 = vld [vmem:[#allocation50_spill] sm:$0xff] }
 0x132   :  { %v2259_v39 = vmul.f32 %v829_v16, %v2008_v22  ;;  %v2268_v59 = vmul.f32 %v832_v30, %v2020_v49  ;;  %v2271_v24 = vmul.f32 %v833_v2, %v2029_v3  ;;  %v2274_v1 = vmul.f32 %v834_v21, %v2041_v14  ;;  %v2947_v22 = vld [vmem:[#allocation49_spill] sm:$0xff]  ;;  %v2950_v7 = vld [vmem:[#allocation52_spill] sm:$0xff]  ;;  %v2954_v2 = vld [vmem:[#allocation54_spill] sm:$0xff] }
 0x133   :  { %2938 = vst [vmem:[#allocation19_spill] sm:$0xff] %v2253_v20  ;;  %2939 = vst [vmem:[#allocation20_spill] sm:$0xff] %v2256_v38  ;;  %v2277_v52 = vmul.f32 %v581_v43, %v2946_v26  ;;  %v2280_v34 = vmul.f32 %v581_v43, %v2947_v22  ;;  %v2283_v63 = vmul.f32 %v581_v43, %v2948_v19  ;;  %v2952_v49 = vld [vmem:[#allocation53_spill] sm:$0xff]  ;;  %v2956_v21 = vld [vmem:[#allocation55_spill] sm:$0xff]  ;;  %v621_v20 = vpop.permute.xlu0 %620 }
 0x134   :  { %2940 = vst [vmem:[#allocation21_spill] sm:$0xff] %v2259_v39  ;;  %2941 = vst [vmem:[#allocation98_spill] sm:$0xff] %v2262_v48  ;;  %v2286_v44 = vmul.f32 %v581_v43, %v2950_v7  ;;  %v2289_v30 = vmul.f32 %v581_v43, %v2952_v49  ;;  %v2292_v3 = vmul.f32 %v581_v43, %v2954_v2  ;;  %v2958_v11 = vld [vmem:[#allocation56_spill] sm:$0xff] }
 0x135   :  { %2942 = vst [vmem:[#allocation99_spill] sm:$0xff] %v2265_v62  ;;  %2943 = vst [vmem:[#allocation100_spill] sm:$0xff] %v2268_v59  ;;  %v2295_v14 = vmul.f32 %v581_v43, %v2956_v21  ;;  %v2298_v16 = vmul.f32 %v581_v43, %v2958_v11  ;;  %v307_v55 = vmul.f32 %v305_v5, %v2922_v27 }
 0x136   :  { %2944 = vst [vmem:[#allocation101_spill] sm:$0xff] %v2271_v24  ;;  %2945 = vst [vmem:[#allocation77_spill] sm:$0xff] %v2274_v1  ;;  %v308_v1 = vmul.f32 %v305_v5, %v2923_v42  ;;  %v309_v24 = vmul.f32 %v305_v5, %v2924_v28  ;;  %v310_v59 = vmul.f32 %v305_v5, %v2925_v61  ;;  %v2964_v42 = vld [vmem:[#allocation70_spill] sm:$0xff]  ;;  %v2966_v28 = vld [vmem:[#allocation71_spill] sm:$0xff] }
 0x137   :  { %2949 = vst [vmem:[#allocation78_spill] sm:$0xff] %v2283_v63  ;;  %2951 = vst [vmem:[#allocation79_spill] sm:$0xff] %v2286_v44  ;;  %v311_v62 = vmul.f32 %v305_v5, %v2926_v47  ;;  %v312_v48 = vmul.f32 %v305_v5, %v2927_v9  ;;  %v313_v39 = vmul.f32 %v305_v5, %v2928_v15  ;;  %v2968_v47 = vld [vmem:[#allocation72_spill] sm:$0xff]  ;;  %v2970_v9 = vld [vmem:[#allocation73_spill] sm:$0xff]  ;;  %v318_v63 = vpop.permute.xlu1 %317 }
 0x138   :  { %2953 = vst [vmem:[#allocation80_spill] sm:$0xff] %v2289_v30  ;;  %2955 = vst [vmem:[#allocation81_spill] sm:$0xff] %v2292_v3  ;;  %v314_v38 = vmul.f32 %v305_v5, %v2929_v54  ;;  %v2315_v3 = vmul.f32 %v853_v35, %v2964_v42  ;;  %v2318_v61 = vmul.f32 %v853_v35, %v2966_v28  ;;  %v2972_v5 = vld [vmem:[#allocation74_spill] sm:$0xff]  ;;  %v2974_v44 = vld [vmem:[#allocation75_spill] sm:$0xff] }
 0x139   :  { %2957 = vst [vmem:[#allocation82_spill] sm:$0xff] %v2295_v14  ;;  %2959 = vst [vmem:[#allocation46_spill] sm:$0xff] %v2298_v16  ;;  %v2960_v14 = vld [vmem:[#allocation68_spill] sm:$0xff]  ;;  %v2962_v16 = vld [vmem:[#allocation69_spill] sm:$0xff]  ;;  %v2321_v30 = vmul.f32 %v853_v35, %v2968_v47  ;;  %v2324_v15 = vmul.f32 %v853_v35, %v2970_v9  ;;  %v2327_v54 = vmul.f32 %v853_v35, %v2972_v5 }
 0x13a   :  { %v2309_v43 = vmul.f32 %v853_v35, %v2960_v14  ;;  %v2312_v27 = vmul.f32 %v853_v35, %v2962_v16  ;;  %2965 = vst [vmem:[#allocation31_spill] sm:$0xff] %v2315_v3  ;;  %2967 = vst [vmem:[#allocation32_spill] sm:$0xff] %v2318_v61  ;;  %v2336_v3 = vmul.f32 %v621_v20, %v2947_v22 }
 0x13b   :  { %2969 = vst [vmem:[#allocation33_spill] sm:$0xff] %v2321_v30  ;;  %2971 = vst [vmem:[#allocation34_spill] sm:$0xff] %v2324_v15  ;;  %v2339_v61 = vmul.f32 %v621_v20, %v2948_v19  ;;  %v2342_v30 = vmul.f32 %v621_v20, %v2950_v7  ;;  %v2345_v15 = vmul.f32 %v621_v20, %v2952_v49 }
 0x13c   :  { %2961 = vst [vmem:[#allocation47_spill] sm:$0xff] %v2309_v43  ;;  %2963 = vst [vmem:[#allocation30_spill] sm:$0xff] %v2312_v27  ;;  %v2330_v43 = vmul.f32 %v853_v35, %v2974_v44  ;;  %v2333_v27 = vmul.f32 %v621_v20, %v2946_v26  ;;  %v2351_v35 = vmul.f32 %v621_v20, %v2956_v21 }
 0x13d   :  { %2973 = vst [vmem:[#allocation35_spill] sm:$0xff] %v2327_v54  ;;  %2977 = vst [vmem:[#allocation60_spill] sm:$0xff] %v2336_v3  ;;  %v2348_v54 = vmul.f32 %v621_v20, %v2954_v2  ;;  %v2354_v26 = vmul.f32 %v621_v20, %v2958_v11  ;;  %v320_v22 = vadd.f32 %v318_v63, %v307_v55 }
 0x13e   :  { %2975 = vst [vmem:[#allocation36_spill] sm:$0xff] %v2330_v43  ;;  %2976 = vst [vmem:[#allocation37_spill] sm:$0xff] %v2333_v27  ;;  %v321_v43 = vadd.f32 %v318_v63, %v308_v1  ;;  %v322_v3 = vadd.f32 %v318_v63, %v309_v24  ;;  %v323_v19 = vadd.f32 %v318_v63, %v310_v59 }
 0x13f   :  { %2978 = vst [vmem:[#allocation61_spill] sm:$0xff] %v2339_v61  ;;  %2979 = vst [vmem:[#allocation62_spill] sm:$0xff] %v2342_v30  ;;  %v324_v61 = vadd.f32 %v318_v63, %v311_v62  ;;  %v325_v27 = vadd.f32 %v318_v63, %v312_v48  ;;  %v326_v7 = vadd.f32 %v318_v63, %v313_v39  ;;  %v893_v62 = vpop.permute.xlu0 %892 }
 0x140   :  { %2980 = vst [vmem:[#allocation63_spill] sm:$0xff] %v2345_v15  ;;  %2981 = vst [vmem:[#allocation64_spill] sm:$0xff] %v2351_v35  ;;  %v327_v30 = vadd.f32 %v318_v63, %v314_v38  ;;  %v328_v49 = vmul.f32 %v320_v22, %v2054_v45  ;;  %v329_v15 = vmul.f32 %v321_v43, %v2058_v60  ;;  %v361_v43 = vpop.permute.xlu1 %360 }
 0x141   :  { %v330_v2 = vmul.f32 %v322_v3, %v2062_v18  ;;  %v331_v21 = vmul.f32 %v323_v19, %v2066_v51  ;;  %v332_v35 = vmul.f32 %v324_v61, %v2070_v33  ;;  %v333_v20 = vmul.f32 %v325_v27, %v2074_v53  ;;  %v2990_v19 = vld [vmem:[#allocation24_spill] sm:$0xff] }
 0x142   :  { %v334_v1 = vmul.f32 %v326_v7, %v2078_v23  ;;  %v335_v59 = vmul.f32 %v327_v30, %v2082_v50  ;;  %v336_v39 = vsub.f32 %v2133_v13, %v328_v49  ;;  %v337_v38 = vsub.f32 %v2136_v25, %v329_v15  ;;  %v2992_v49 = vld [vmem:[#allocation25_spill] sm:$0xff] }
 0x143   :  { %v338_v48 = vsub.f32 %v2139_v6, %v330_v2  ;;  %v339_v24 = vsub.f32 %v2142_v10, %v331_v21  ;;  %v340_v63 = vsub.f32 %v2145_v58, %v332_v35  ;;  %v341_v3 = vsub.f32 %v2148_v37, %v333_v20  ;;  %v2988_v35 = vld [vmem:[#allocation23_spill] sm:$0xff]  ;;  %v2994_v21 = vld [vmem:[#allocation38_spill] sm:$0xff] }
 0x144   :  { %v342_v11 = vsub.f32 %v2151_v17, %v334_v1  ;;  %v343_v55 = vsub.f32 %v2154_v32, %v335_v59  ;;  %v2373_v30 = vmul.f32 %v893_v62, %v2960_v14  ;;  %v2376_v13 = vmul.f32 %v893_v62, %v2962_v16  ;;  %v593_v15 = vpop.permute.xlu1 %592  ;;  %v2995_v20 = vld [vmem:[#allocation39_spill] sm:$0xff]  ;;  %v2996_v59 = vld [vmem:[#allocation40_spill] sm:$0xff] }
 0x145   :  { %v2379_v25 = vmul.f32 %v893_v62, %v2964_v42  ;;  %v2382_v6 = vmul.f32 %v893_v62, %v2966_v28  ;;  %v2385_v10 = vmul.f32 %v893_v62, %v2968_v47  ;;  %v2388_v58 = vmul.f32 %v893_v62, %v2970_v9 }
 0x146   :  { %v2391_v37 = vmul.f32 %v893_v62, %v2972_v5  ;;  %v2394_v17 = vmul.f32 %v893_v62, %v2974_v44  ;;  %v363_v32 = vsub.f32 %v361_v43, %v2221_v41  ;;  %v364_v14 = vsub.f32 %v361_v43, %v2224_v56 }
 0x147   :  { %v365_v16 = vsub.f32 %v361_v43, %v2227_v8  ;;  %v366_v27 = vsub.f32 %v361_v43, %v2230_v0  ;;  %v367_v42 = vsub.f32 %v361_v43, %v2233_v46  ;;  %v368_v28 = vsub.f32 %v361_v43, %v2236_v57 }
 0x148   :  { %v369_v61 = vsub.f32 %v361_v43, %v2239_v12  ;;  %v370_v47 = vsub.f32 %v361_v43, %v2242_v29  ;;  %v371_v9 = vmul.f32 %v363_v32, %v2054_v45  ;;  %v372_v44 = vmul.f32 %v364_v14, %v2058_v60  ;;  %v2997_v43 = vld [vmem:[#allocation41_spill] sm:$0xff]  ;;  %v2998_v14 = vld [vmem:[#allocation42_spill] sm:$0xff] }
 0x149   :  { %v373_v41 = vmul.f32 %v365_v16, %v2062_v18  ;;  %v374_v56 = vmul.f32 %v366_v27, %v2066_v51  ;;  %v375_v8 = vmul.f32 %v367_v42, %v2070_v33  ;;  %v376_v0 = vmul.f32 %v368_v28, %v2074_v53  ;;  %v2999_v27 = vld [vmem:[#allocation43_spill] sm:$0xff]  ;;  %v3000_v28 = vld [vmem:[#allocation44_spill] sm:$0xff] }
 0x14a   :  { %v377_v46 = vmul.f32 %v369_v61, %v2078_v23  ;;  %v378_v57 = vmul.f32 %v370_v47, %v2082_v50  ;;  %v2982_v12 = vsub.f32 0.0, %v1969_v40  ;;  %v2983_v45 = vsub.f32 0.0, %v1972_v4  ;;  %v2986_v23 = vld [vmem:[#allocation22_spill] sm:$0xff] }
 0x14b   :  { %v2984_v18 = vsub.f32 0.0, %v1975_v31  ;;  %v2985_v33 = vsub.f32 0.0, %v1978_v36  ;;  %v2987_v5 = vsub.f32 0.0, %v2986_v23  ;;  %v2989_v40 = vsub.f32 0.0, %v2988_v35  ;;  %v3012_v35 = vld [vmem:[#allocation92_spill] sm:$0xff] }
 0x14c   :  { %v2414_v29 = vadd.f32 %v371_v9, %v2982_v12  ;;  %v2418_v60 = vadd.f32 %v372_v44, %v2983_v45  ;;  %v2991_v4 = vsub.f32 0.0, %v2990_v19  ;;  %v2993_v31 = vsub.f32 0.0, %v2992_v49  ;;  %v3002_v9 = vld [vmem:[#allocation78_spill] sm:$0xff]  ;;  %v633_v12 = vpop.permute.xlu1 %632  ;;  %v3008_v45 = vld [vmem:[#allocation51_spill] sm:$0xff] }
 0x14d   :  { %v2422_v51 = vadd.f32 %v373_v41, %v2984_v18  ;;  %v2426_v53 = vadd.f32 %v374_v56, %v2985_v33  ;;  %v2430_v50 = vadd.f32 %v375_v8, %v2987_v5  ;;  %v2434_v22 = vadd.f32 %v376_v0, %v2989_v40  ;;  %v3004_v56 = vld [vmem:[#allocation80_spill] sm:$0xff]  ;;  %v3005_v8 = vld [vmem:[#allocation81_spill] sm:$0xff]  ;;  %v3013_v19 = vld [vmem:[#allocation95_spill] sm:$0xff] }
 0x14e   :  { %v2438_v7 = vadd.f32 %v377_v46, %v2991_v4  ;;  %v2442_v2 = vadd.f32 %v378_v57, %v2993_v31  ;;  %v2445_v36 = vadd.f32 %v2994_v21, %v336_v39  ;;  %v2448_v1 = vadd.f32 %v2995_v20, %v337_v38  ;;  %v3001_v39 = vld [vmem:[#allocation45_spill] sm:$0xff]  ;;  %v3007_v57 = vld [vmem:[#allocation46_spill] sm:$0xff]  ;;  %v3014_v49 = vld [vmem:[#allocation59_spill] sm:$0xff] }
 0x14f   :  { %v2451_v62 = vadd.f32 %v2996_v59, %v338_v48  ;;  %v2454_v32 = vadd.f32 %v2997_v43, %v339_v24  ;;  %v2457_v16 = vadd.f32 %v2998_v14, %v340_v63  ;;  %v2460_v42 = vadd.f32 %v2999_v27, %v341_v3  ;;  %v3003_v24 = vld [vmem:[#allocation79_spill] sm:$0xff]  ;;  %v3006_v3 = vld [vmem:[#allocation82_spill] sm:$0xff]  ;;  %v3009_v18 = vld [vmem:[#allocation57_spill] sm:$0xff] }
 0x150   :  { %v2463_v61 = vadd.f32 %v3000_v28, %v342_v11  ;;  %v2466_v47 = vadd.f32 %v3001_v39, %v343_v55  ;;  %v595_v38 = vadd.f32 %v593_v15, %v2277_v52  ;;  %v596_v48 = vadd.f32 %v593_v15, %v2280_v34  ;;  %v3010_v52 = vld [vmem:[#allocation58_spill] sm:$0xff]  ;;  %v3011_v34 = vld [vmem:[#allocation89_spill] sm:$0xff] }
 0x151   :  { %v597_v44 = vadd.f32 %v593_v15, %v3002_v9  ;;  %v598_v41 = vadd.f32 %v593_v15, %v3003_v24  ;;  %v599_v63 = vadd.f32 %v593_v15, %v3004_v56  ;;  %v600_v0 = vadd.f32 %v593_v15, %v3005_v8  ;;  %v3015_v21 = vld [vmem:[#allocation97_spill] sm:$0xff]  ;;  %v3019_v56 = vld [vmem:[#allocation62_spill] sm:$0xff]  ;;  %v3021_v8 = vld [vmem:[#allocation64_spill] sm:$0xff] }
 0x152   :  { %v601_v46 = vadd.f32 %v593_v15, %v3006_v3  ;;  %v602_v11 = vadd.f32 %v593_v15, %v3007_v57  ;;  %v603_v55 = vmul.f32 %v595_v38, %v3008_v45  ;;  %v604_v33 = vmul.f32 %v596_v48, %v3009_v18  ;;  %v3016_v48 = vld [vmem:[#allocation37_spill] sm:$0xff] }
 0x153   :  { %v605_v23 = vmul.f32 %v597_v44, %v3010_v52  ;;  %v606_v5 = vmul.f32 %v598_v41, %v3011_v34  ;;  %v607_v40 = vmul.f32 %v599_v63, %v3012_v35  ;;  %v608_v4 = vmul.f32 %v600_v0, %v3013_v19  ;;  %v3017_v44 = vld [vmem:[#allocation60_spill] sm:$0xff]  ;;  %v3018_v41 = vld [vmem:[#allocation61_spill] sm:$0xff]  ;;  %v3020_v63 = vld [vmem:[#allocation63_spill] sm:$0xff]  ;;  %v865_v0 = vpop.permute.xlu1 %864 }
 0x154   :  { %v609_v31 = vmul.f32 %v601_v46, %v3014_v49  ;;  %v610_v20 = vmul.f32 %v602_v11, %v3015_v21  ;;  %v611_v59 = vsub.f32 %v2445_v36, %v603_v55  ;;  %v612_v15 = vsub.f32 %v2448_v1, %v604_v33  ;;  %v3022_v33 = vld [vmem:[#allocation47_spill] sm:$0xff] }
 0x155   :  { %v613_v43 = vsub.f32 %v2451_v62, %v605_v23  ;;  %v614_v14 = vsub.f32 %v2454_v32, %v606_v5  ;;  %v615_v27 = vsub.f32 %v2457_v16, %v607_v40  ;;  %v616_v28 = vsub.f32 %v2460_v42, %v608_v4  ;;  %v3024_v5 = vld [vmem:[#allocation31_spill] sm:$0xff]  ;;  %v3025_v40 = vld [vmem:[#allocation32_spill] sm:$0xff]  ;;  %v3026_v4 = vld [vmem:[#allocation33_spill] sm:$0xff] }
 0x156   :  { %v617_v39 = vsub.f32 %v2463_v61, %v609_v31  ;;  %v618_v38 = vsub.f32 %v2466_v47, %v610_v20  ;;  %v635_v9 = vsub.f32 %v633_v12, %v3016_v48  ;;  %v636_v24 = vsub.f32 %v633_v12, %v3017_v44  ;;  %v3027_v31 = vld [vmem:[#allocation34_spill] sm:$0xff]  ;;  %v3028_v20 = vld [vmem:[#allocation35_spill] sm:$0xff]  ;;  %v3029_v48 = vld [vmem:[#allocation36_spill] sm:$0xff] }
 0x157   :  { %v637_v36 = vsub.f32 %v633_v12, %v3018_v41  ;;  %v638_v1 = vsub.f32 %v633_v12, %v3019_v56  ;;  %v639_v62 = vsub.f32 %v633_v12, %v3020_v63  ;;  %v640_v32 = vsub.f32 %v633_v12, %v2348_v54 }
 0x158   :  { %v641_v16 = vsub.f32 %v633_v12, %v3021_v8  ;;  %v642_v42 = vsub.f32 %v633_v12, %v2354_v26  ;;  %v643_v61 = vmul.f32 %v635_v9, %v3008_v45  ;;  %v644_v47 = vmul.f32 %v636_v24, %v3009_v18  ;;  %v3023_v26 = vld [vmem:[#allocation30_spill] sm:$0xff]  ;;  %v3030_v9 = vld [vmem:[#allocation91_spill] sm:$0xff]  ;;  %v3032_v24 = vld [vmem:[#allocation96_spill] sm:$0xff] }
 0x159   :  { %v645_v3 = vmul.f32 %v637_v36, %v3010_v52  ;;  %v646_v46 = vmul.f32 %v638_v1, %v3011_v34  ;;  %v647_v57 = vmul.f32 %v639_v62, %v3012_v35  ;;  %v648_v11 = vmul.f32 %v640_v32, %v3013_v19  ;;  %v3033_v36 = vld [vmem:[#allocation14_spill] sm:$0xff]  ;;  %v3034_v1 = vld [vmem:[#allocation15_spill] sm:$0xff]  ;;  %v3035_v62 = vld [vmem:[#allocation16_spill] sm:$0xff] }
 0x15a   :  { %v649_v55 = vmul.f32 %v641_v16, %v3014_v49  ;;  %v650_v54 = vmul.f32 %v642_v42, %v3015_v21  ;;  %v867_v23 = vadd.f32 %v865_v0, %v3022_v33  ;;  %v868_v12 = vadd.f32 %v865_v0, %v3023_v26  ;;  %v3031_v21 = vld [vmem:[#allocation94_spill] sm:$0xff]  ;;  %v3036_v8 = vld [vmem:[#allocation17_spill] sm:$0xff] }
 0x15b   :  { %v869_v45 = vadd.f32 %v865_v0, %v3024_v5  ;;  %v870_v18 = vadd.f32 %v865_v0, %v3025_v40  ;;  %v871_v52 = vadd.f32 %v865_v0, %v3026_v4  ;;  %v872_v34 = vadd.f32 %v865_v0, %v3027_v31  ;;  %v3037_v42 = vld [vmem:[#allocation18_spill] sm:$0xff] }
 0x15c   :  { %v873_v35 = vadd.f32 %v865_v0, %v3028_v20  ;;  %v874_v19 = vadd.f32 %v865_v0, %v3029_v48  ;;  %v571_v49 = vsub.f32 %v2414_v29, %v3030_v9  ;;  %v572_v44 = vsub.f32 %v2418_v60, %v3031_v21  ;;  %v3039_v40 = vld [vmem:[#allocation90_spill] sm:$0xff]  ;;  %v3047_v21 = vld [vmem:[#allocation20_spill] sm:$0xff] }
 0x15d   :  { %v573_v41 = vsub.f32 %v2422_v51, %v3032_v24  ;;  %v574_v56 = vsub.f32 %v2426_v53, %v3033_v36  ;;  %v575_v63 = vsub.f32 %v2430_v50, %v3034_v1  ;;  %v576_v32 = vsub.f32 %v2434_v22, %v3035_v62  ;;  %v3050_v24 = vld [vmem:[#allocation99_spill] sm:$0xff]  ;;  %v3053_v36 = vld [vmem:[#allocation77_spill] sm:$0xff]  ;;  %v3054_v1 = vld [vmem:[#allocation26_spill] sm:$0xff] }
 0x15e   :  { %v577_v16 = vsub.f32 %v2438_v7, %v3036_v8  ;;  %v578_v29 = vsub.f32 %v2442_v2, %v3037_v42  ;;  %v2532_v0 = vadd.f32 %v643_v61, %v571_v49  ;;  %v2534_v60 = vadd.f32 %v644_v47, %v572_v44  ;;  %v3038_v7 = vld [vmem:[#allocation84_spill] sm:$0xff]  ;;  %v3040_v61 = vld [vmem:[#allocation93_spill] sm:$0xff]  ;;  %v3041_v47 = vld [vmem:[#allocation83_spill] sm:$0xff] }
 0x15f   :  { %v2536_v51 = vadd.f32 %v645_v3, %v573_v41  ;;  %v2538_v33 = vadd.f32 %v646_v46, %v574_v56  ;;  %v2540_v53 = vadd.f32 %v647_v57, %v575_v63  ;;  %v2542_v50 = vadd.f32 %v648_v11, %v576_v32  ;;  %v3042_v3 = vld [vmem:[#allocation85_spill] sm:$0xff]  ;;  %v3043_v46 = vld [vmem:[#allocation86_spill] sm:$0xff]  ;;  %v3044_v57 = vld [vmem:[#allocation87_spill] sm:$0xff] }
 0x160   :  { %v2544_v26 = vadd.f32 %v649_v55, %v577_v16  ;;  %v2546_v22 = vadd.f32 %v650_v54, %v578_v29  ;;  %v803_v5 = vadd.f32 %v3038_v7, %v611_v59  ;;  %v804_v2 = vadd.f32 %v3039_v40, %v612_v15  ;;  %v3045_v11 = vld [vmem:[#allocation88_spill] sm:$0xff]  ;;  %v3046_v55 = vld [vmem:[#allocation19_spill] sm:$0xff]  ;;  %v3048_v44 = vld [vmem:[#allocation21_spill] sm:$0xff] }
 0x161   :  { %v805_v4 = vadd.f32 %v3040_v61, %v613_v43  ;;  %v806_v31 = vadd.f32 %v3041_v47, %v614_v14  ;;  %v807_v20 = vadd.f32 %v3042_v3, %v615_v27  ;;  %v808_v48 = vadd.f32 %v3043_v46, %v616_v28  ;;  %v3049_v43 = vld [vmem:[#allocation98_spill] sm:$0xff]  ;;  %v3051_v28 = vld [vmem:[#allocation100_spill] sm:$0xff]  ;;  %v3052_v41 = vld [vmem:[#allocation101_spill] sm:$0xff] }
 0x162   :  { %v809_v9 = vadd.f32 %v3044_v57, %v617_v39  ;;  %v810_v49 = vadd.f32 %v3045_v11, %v618_v38  ;;  %v843_v54 = vsub.f32 %v2532_v0, %v3046_v55  ;;  %v844_v59 = vsub.f32 %v2534_v60, %v3047_v21  ;;  %v3055_v62 = vld [vmem:[#allocation27_spill] sm:$0xff]  ;;  %v3056_v8 = vld [vmem:[#allocation28_spill] sm:$0xff]  ;;  %v3057_v42 = vld [vmem:[#allocation29_spill] sm:$0xff]  ;;  %v905_v0 = vpop.permute.xlu1 %904 }
 0x163   :  { %v845_v15 = vsub.f32 %v2536_v51, %v3048_v44  ;;  %v846_v14 = vsub.f32 %v2538_v33, %v3049_v43  ;;  %v847_v27 = vsub.f32 %v2540_v53, %v3050_v24  ;;  %v848_v39 = vsub.f32 %v2542_v50, %v3051_v28  ;;  %v3058_v60 = vld [vmem:[#allocation102_spill] sm:$0xff]  ;;  %v3059_v33 = vld [vmem:[#allocation103_spill] sm:$0xff]  ;;  %v3060_v50 = vld [vmem:[#allocation104_spill] sm:$0xff] }
 0x164   :  { %v849_v38 = vsub.f32 %v2544_v26, %v3052_v41  ;;  %v850_v56 = vsub.f32 %v2546_v22, %v3053_v36  ;;  %v875_v63 = vmul.f32 %v867_v23, %v3054_v1  ;;  %v876_v32 = vmul.f32 %v868_v12, %v3055_v62  ;;  %v3061_v7 = vld [vmem:[#allocation76_spill] sm:$0xff] }
 0x165   :  { %v877_v16 = vmul.f32 %v869_v45, %v3056_v8  ;;  %v878_v29 = vmul.f32 %v870_v18, %v3057_v42  ;;  %v879_v51 = vmul.f32 %v871_v52, %v3058_v60  ;;  %v880_v53 = vmul.f32 %v872_v34, %v3059_v33 }
 0x166   :  { %v881_v26 = vmul.f32 %v873_v35, %v3060_v50  ;;  %v882_v40 = vmul.f32 %v874_v19, %v3061_v7  ;;  %v883_v22 = vsub.f32 %v803_v5, %v875_v63  ;;  %v884_v61 = vsub.f32 %v804_v2, %v876_v32 }
 0x167   :  { %v885_v23 = vsub.f32 %v805_v4, %v877_v16  ;;  %v886_v47 = vsub.f32 %v806_v31, %v878_v29  ;;  %v887_v12 = vsub.f32 %v807_v20, %v879_v51  ;;  %v888_v3 = vsub.f32 %v808_v48, %v880_v53 }
 0x168   :  { %v889_v45 = vsub.f32 %v809_v9, %v881_v26  ;;  %v890_v46 = vsub.f32 %v810_v49, %v882_v40  ;;  %v907_v18 = vsub.f32 %v905_v0, %v2373_v30  ;;  %v908_v52 = vsub.f32 %v905_v0, %v2376_v13  ;;  %934 = vst [vmem:[#allocation7] sm:$0xff] %v883_v22 }
 0x169   :  { %v909_v34 = vsub.f32 %v905_v0, %v2379_v25  ;;  %v910_v35 = vsub.f32 %v905_v0, %v2382_v6  ;;  %935 = vst [vmem:[#allocation7 + $0x8] sm:$0xff] %v884_v61  ;;  %936 = vst [vmem:[#allocation7 + $0x10] sm:$0xff] %v885_v23  ;;  %v911_v19 = vsub.f32 %v905_v0, %v2385_v10 }
 0x16a   :  { %937 = vst [vmem:[#allocation7 + $0x18] sm:$0xff] %v886_v47  ;;  %v912_v5 = vsub.f32 %v905_v0, %v2388_v58  ;;  %v913_v2 = vsub.f32 %v905_v0, %v2391_v37  ;;  %v914_v30 = vsub.f32 %v905_v0, %v2394_v17  ;;  %938 = vst [vmem:[#allocation7 + $0x20] sm:$0xff] %v887_v12 }
 0x16b   :  { %939 = vst [vmem:[#allocation7 + $0x28] sm:$0xff] %v888_v3  ;;  %940 = vst [vmem:[#allocation7 + $0x30] sm:$0xff] %v889_v45  ;;  %v915_v13 = vmul.f32 %v907_v18, %v3054_v1  ;;  %v916_v25 = vmul.f32 %v908_v52, %v3055_v62  ;;  %v917_v6 = vmul.f32 %v909_v34, %v3056_v8 }
 0x16c   :  { %941 = vst [vmem:[#allocation7 + $0x38] sm:$0xff] %v890_v46  ;;  %v918_v10 = vmul.f32 %v910_v35, %v3057_v42 }
 0x16d   :  { %1136 = shalt.err (!%p1133_p0)
}
 0x16e   :  { %961 = dma.vmem_to_hbm [thread:$0]  %s2580_s24, 1024, %s2611_s2, [#allocation4]   ;;  %v919_v58 = vmul.f32 %v911_v19, %v3058_v60  ;;  %v920_v37 = vmul.f32 %v912_v5, %v3059_v33  ;;  %v921_v17 = vmul.f32 %v913_v2, %v3060_v50  ;;  %v922_v4 = vmul.f32 %v914_v30, %v3061_v7 }
 0x16f   :  { %v923_v31 = vadd.f32 %v915_v13, %v843_v54  ;;  %v924_v20 = vadd.f32 %v916_v25, %v844_v59  ;;  %v925_v48 = vadd.f32 %v917_v6, %v845_v15  ;;  %v926_v57 = vadd.f32 %v918_v10, %v846_v14  ;;  %s1145_s2 = scalar_lea.vmem %s969_s26, 1024  ;;  %p1150_p2 = scmp.lt.s32.totalorder %s969_s26, %s969_s26 }
 0x170   :  { %v927_v9 = vadd.f32 %v919_v58, %v847_v27  ;;  %v928_v11 = vadd.f32 %v920_v37, %v848_v39  ;;  %v929_v49 = vadd.f32 %v921_v17, %v849_v38  ;;  %v930_v55 = vadd.f32 %v922_v4, %v850_v56  ;;  %p1146_p1 = scmp.ne.s32.totalorder %s969_s26, %s1145_s2  ;;  %p1151_p3 = scmp.lt.s32.totalorder %s1145_s2, %s1145_s2 }
 0x171   :  { %944 = vst [vmem:[#allocation8] sm:$0xff] %v923_v31  ;;  %945 = vst [vmem:[#allocation8 + $0x8] sm:$0xff] %v924_v20 }
 0x172   :  { %946 = vst [vmem:[#allocation8 + $0x10] sm:$0xff] %v925_v48  ;;  %947 = vst [vmem:[#allocation8 + $0x18] sm:$0xff] %v926_v57  ;;  %p1152_p4 = por %p1151_p3, %p1150_p2 }
 0x173   :  { %948 = vst [vmem:[#allocation8 + $0x20] sm:$0xff] %v927_v9  ;;  %949 = vst [vmem:[#allocation8 + $0x28] sm:$0xff] %v928_v11 }
 0x174   :  { %950 = vst [vmem:[#allocation8 + $0x30] sm:$0xff] %v929_v49  ;;  %951 = vst [vmem:[#allocation8 + $0x38] sm:$0xff] %v930_v55  ;;  %p1153_p5 = pnand %p1152_p4, %p1146_p1 }
 0x176   :  { %1156 = shalt.err (!%p1153_p5)
}
 0x177   :  { %971 = dma.vmem_to_hbm [thread:$0]  %s969_s26, 1024, %s2612_s3, [#allocation9]  }
 0x178   :  { %1169 = dma.done.wait [#allocation4], 1024  }
 0x179   :  { %1170 = vsyncadd [#allocation4], 4294966272 }
 0x17a   :  { %1171 = dma.done.wait [#allocation9], 1024  }
 0x17b   :  { %1172 = vsyncadd [#allocation9], 4294966272 }
 0x17c   :  { %978 = vsyncpa [#allocation3], 1 }
 0x17d   :  { %979 = vsyncpa [#allocation6], 1 }
 0x17e   :  { %980 = vsyncpa [#allocation4], 1 }
 0x17f   :  { %981 = vsyncpa [#allocation9], 1 }

</bundles_post_ra>
